<compile_context>
chip_gen: v6e
topology: v6e:2x2x1
jax: 0.10.0
libtpu: 0.0.40
codegen_flags: <defaults>
</compile_context>

<pallas_src>
import functools

import jax
import jax.numpy as jnp
from jax.experimental import pallas as pl
from jax.experimental.pallas import tpu as pltpu


def _round_up(x, m):
    return ((x + m - 1) // m) * m


def _attn_pool_kernel(x_ref, qb_ref, kvb_ref, poskv_ref, wq_ref, wkv_ref,
                      wc_ref, bc_ref, hr_ref, he_ref, o_ref, *, num_heads):
    xb = x_ref[...]                                        # (bb, HW, C) f32
    bb, hw, c = xb.shape

    # ---- mean token (positional embedding already folded into the projected
    #      bias rows computed in the wrapper).
    mean_x = jnp.mean(xb, axis=1)                          # (bb, C)

    # ---- projections.  Q only for the mean-token query (the only output row
    #      the module returns); fused K|V projection for all tokens.
    q = jnp.dot(mean_x, wq_ref[...],
                preferred_element_type=jnp.float32) + qb_ref[...]        # (bb, C), pre-scaled
    kv_m = jnp.dot(mean_x, wkv_ref[...],
                   preferred_element_type=jnp.float32) + kvb_ref[...]    # (bb, 2C)
    k_m, v_m = kv_m[:, :c], kv_m[:, c:]                    # (bb, C) each

    kv_s = jnp.dot(xb.reshape(bb * hw, c), wkv_ref[...],
                   preferred_element_type=jnp.float32)                   # (bb*HW, 2C)
    kv_s = kv_s.reshape(bb, hw, 2 * c) + poskv_ref[...][None, :, :]
    k_s, v_s = kv_s[:, :, :c], kv_s[:, :, c:]              # (bb, HW, C) each

    # ---- per-head scores via the block-diagonal head-reduce matrix
    #      hr (C, H):  s[b, t, h] = sum_{c in head h} q[b, c] * k[b, t, c]
    s_m = jnp.dot(q * k_m, hr_ref[...],
                  preferred_element_type=jnp.float32)                    # (bb, H)
    s_s = jnp.dot((k_s * q[:, None, :]).reshape(bb * hw, c), hr_ref[...],
                  preferred_element_type=jnp.float32)
    s_s = s_s.reshape(bb, hw, num_heads)                                 # (bb, HW, H)

    # ---- numerically-stable softmax over the T = HW+1 keys (mean + spatial),
    #      normalization deferred to the very end (one scale on the context).
    m = jnp.maximum(s_m, jnp.max(s_s, axis=1))             # (bb, H)
    p_m = jnp.exp(s_m - m)                                 # (bb, H)
    p_s = jnp.exp(s_s - m[:, None, :])                     # (bb, HW, H)
    denom = p_m + jnp.sum(p_s, axis=1)                     # (bb, H)
    inv = pl.reciprocal(denom, approx=True)                # EUP slot
    inv = inv * (2.0 - denom * inv)                        # one NR step -> f32 accuracy

    # ---- weighted value sum: expand head probs to channels with he (H, C)
    pc_m = jnp.dot(p_m, he_ref[...],
                   preferred_element_type=jnp.float32)                   # (bb, C)
    pc_s = jnp.dot(p_s.reshape(bb * hw, num_heads), he_ref[...],
                   preferred_element_type=jnp.float32).reshape(bb, hw, c)
    ctx = (pc_m * v_m + jnp.sum(pc_s * v_s, axis=1)) * jnp.dot(
        inv, he_ref[...], preferred_element_type=jnp.float32)            # (bb, C)

    # ---- output projection (out_dim padded to a lane-dense 128 multiple)
    out = jnp.dot(ctx, wc_ref[...],
                  preferred_element_type=jnp.float32) + bc_ref[...]      # (bb, out_pad)
    o_ref[...] = out.astype(o_ref.dtype)


def attention_pool_2d(x, pos, wq, bq, wk, bk, wv, bv, wc, bc, *, num_heads):
    """x: (N, C, H, W) NCHW.  Linear weights are (in, out).  Returns (N, out_dim)."""
    n, c, h, w = x.shape
    hw = h * w
    out_dim = wc.shape[1]
    assert c % num_heads == 0, "embed_dim must be divisible by num_heads"
    assert hw % 8 == 0, "spatial token count must be sublane (8) aligned"
    assert pos.shape == (hw + 1, c)
    hd = c // num_heads
    f32 = jnp.float32

    # glue: NCHW -> (N, HW, C) token-major.
    # TODO(synk): fold this transpose into the producing conv (or take (N,C,HW)
    # blocks and contract over C) to avoid an extra HBM round-trip of x.
    x_tok = jnp.transpose(x.reshape(n, c, hw), (0, 2, 1)).astype(f32)

    # ---- batch tiling: aim for >=128 MXU rows per grid step, 8-aligned.
    bb = max(8, 128 // hw) if hw < 128 else 8
    bb = _round_up(bb, 8)
    n_pad = _round_up(max(n, 1), bb)
    if n_pad != n:
        x_tok = jnp.pad(x_tok, ((0, n_pad - n), (0, 0), (0, 0)))

    # ---- grid-invariant parameter preprocessing (host/XLA side).
    scale = 1.0 / (hd ** 0.5)
    wq_s = (wq * scale).astype(f32)                                  # scale folded in
    bq_s = (bq.reshape(1, c) * scale).astype(f32)
    wkv = jnp.concatenate([wk, wv], axis=1).astype(f32)              # (C, 2C)
    bkv = jnp.concatenate([bk.reshape(1, c), bv.reshape(1, c)], axis=1).astype(f32)

    pos_m = pos[:1].astype(f32)                                      # (1, C) mean token
    pos_s = pos[1:].astype(f32)                                      # (HW, C) spatial
    # pre-project the positional embedding through the weights so the kernel
    # never forms x + pos (grid-invariant hoist).
    qbias_m = (pos_m @ wq_s + bq_s).astype(f32)                      # (1, C)
    kvbias_m = (pos_m @ wkv + bkv).astype(f32)                       # (1, 2C)
    poskv_s = (pos_s @ wkv + bkv).astype(f32)                        # (HW, 2C)

    out_pad = _round_up(out_dim, 128)                                # lane-dense output
    wc_p = jnp.pad(wc.astype(f32), ((0, 0), (0, out_pad - out_dim)))
    bc_p = jnp.pad(bc.reshape(1, out_dim).astype(f32), ((0, 0), (0, out_pad - out_dim)))

    head_ids = jnp.arange(c) // hd
    hr = (head_ids[:, None] == jnp.arange(num_heads)[None, :]).astype(f32)  # (C, H)
    he = jnp.transpose(hr)                                                  # (H, C)

    kernel = functools.partial(_attn_pool_kernel, num_heads=num_heads)
    out = pl.pallas_call(
        kernel,
        out_shape=jax.ShapeDtypeStruct((n_pad, out_pad), f32),
        grid_spec=pltpu.PrefetchScalarGridSpec(
            num_scalar_prefetch=0,
            grid=(n_pad // bb,),
            in_specs=[
                pl.BlockSpec((bb, hw, c), lambda b: (b, 0, 0)),      # x tokens (batch tile)
                pl.BlockSpec((1, c), lambda b: (0, 0)),              # q bias (mean token)
                pl.BlockSpec((1, 2 * c), lambda b: (0, 0)),          # kv bias (mean token)
                pl.BlockSpec((hw, 2 * c), lambda b: (0, 0)),         # pos-projected kv bias
                pl.BlockSpec((c, c), lambda b: (0, 0)),              # Wq (pre-scaled)
                pl.BlockSpec((c, 2 * c), lambda b: (0, 0)),          # [Wk | Wv]
                pl.BlockSpec((c, out_pad), lambda b: (0, 0)),        # Wc (lane-padded)
                pl.BlockSpec((1, out_pad), lambda b: (0, 0)),        # bc (lane-padded)
                pl.BlockSpec((c, num_heads), lambda b: (0, 0)),      # head-reduce R
                pl.BlockSpec((num_heads, c), lambda b: (0, 0)),      # head-expand R^T
            ],
            out_specs=pl.BlockSpec((bb, out_pad), lambda b: (b, 0)),
        ),
        compiler_params=pltpu.CompilerParams(
            dimension_semantics=("parallel",)),
        # Toy sizes fit well under the default scoped-VMEM limit; at CLIP
        # scale set vmem_limit_bytes and/or tile the weight output dim.
    )(x_tok, qbias_m, kvbias_m, poskv_s, wq_s, wkv, wc_p, bc_p, hr, he)
    return out[:n, :out_dim]


def reference(x, pos, wq, bq, wk, bk, wv, bv, wc, bc, *, num_heads):
    """Pure-JAX reference mirroring F.multi_head_attention_forward semantics."""
    n, c, h, w = x.shape
    tok = jnp.transpose(x.reshape(n, c, h * w), (0, 2, 1)).astype(jnp.float32)
    mean_tok = tok.mean(axis=1, keepdims=True)
    tok = jnp.concatenate([mean_tok, tok], axis=1) + pos[None]
    t = tok.shape[1]
    hd = c // num_heads
    q = (tok @ wq + bq) / jnp.sqrt(jnp.float32(hd))
    k = tok @ wk + bk
    v = tok @ wv + bv
    qh = q.reshape(n, t, num_heads, hd).transpose(0, 2, 1, 3)
    kh = k.reshape(n, t, num_heads, hd).transpose(0, 2, 1, 3)
    vh = v.reshape(n, t, num_heads, hd).transpose(0, 2, 1, 3)
    s = jnp.einsum('nhqd,nhkd->nhqk', qh, kh)
    p = jax.nn.softmax(s, axis=-1)
    o = jnp.einsum('nhqk,nhkd->nhqd', p, vh)
    o = o.transpose(0, 2, 1, 3).reshape(n, t, c)
    out = o @ wc + bc
    return out[:, 0, :]


if __name__ == "__main__":
    # Module config: spacial_dim=4, embed_dim=32, num_heads=4, output_dim=64
    N, C, H, W = 2, 32, 4, 4
    NUM_HEADS = 4
    OUT_DIM = 64
    T = H * W + 1

    key = jax.random.PRNGKey(0)
    ks = jax.random.split(key, 10)

    x = jax.random.normal(ks[0], (N, C, H, W), dtype=jnp.float32)

    # deterministic synthetic parameters (Linear weights kept as (in, out))
    pos = jax.random.normal(ks[1], (T, C), dtype=jnp.float32) / (C ** 0.5)
    wq = jax.random.normal(ks[2], (C, C), dtype=jnp.float32) * 0.1
    bq = jax.random.normal(ks[3], (1, C), dtype=jnp.float32) * 0.1
    wk = jax.random.normal(ks[4], (C, C), dtype=jnp.float32) * 0.1
    bk = jax.random.normal(ks[5], (1, C), dtype=jnp.float32) * 0.1
    wv = jax.random.normal(ks[6], (C, C), dtype=jnp.float32) * 0.1
    bv = jax.random.normal(ks[7], (1, C), dtype=jnp.float32) * 0.1
    wc = jax.random.normal(ks[8], (C, OUT_DIM), dtype=jnp.float32) * 0.1
    bc = jax.random.normal(ks[9], (1, OUT_DIM), dtype=jnp.float32) * 0.1

    out = attention_pool_2d(x, pos, wq, bq, wk, bk, wv, bv, wc, bc,
                            num_heads=NUM_HEADS)
    out = jax.block_until_ready(out)

    ref = reference(x, pos, wq, bq, wk, bk, wv, bv, wc, bc,
                    num_heads=NUM_HEADS)
    ref = jax.block_until_ready(ref)

    assert out.shape == (N, OUT_DIM), out.shape
    assert jnp.allclose(out, ref, atol=1e-4, rtol=1e-4), (
        float(jnp.max(jnp.abs(out - ref))))
    print("KERNEL_OK")
</pallas_src>

<mosaic_0001>
module attributes {stable_mosaic.version = 11 : i64} {
  func.func @_attn_pool_kernel(%arg0: i32, %arg1: memref<8x16x32xf32, #tpu.memory_space<vmem>>, %arg2: memref<1x32xf32, #tpu.memory_space<vmem>>, %arg3: memref<1x64xf32, #tpu.memory_space<vmem>>, %arg4: memref<16x64xf32, #tpu.memory_space<vmem>>, %arg5: memref<32x32xf32, #tpu.memory_space<vmem>>, %arg6: memref<32x64xf32, #tpu.memory_space<vmem>>, %arg7: memref<32x128xf32, #tpu.memory_space<vmem>>, %arg8: memref<1x128xf32, #tpu.memory_space<vmem>>, %arg9: memref<32x4xf32, #tpu.memory_space<vmem>>, %arg10: memref<4x32xf32, #tpu.memory_space<vmem>>, %arg11: memref<8x128xf32, #tpu.memory_space<vmem>>) attributes {dimension_semantics = [#tpu.dimension_semantics<parallel>], iteration_bounds = array<i64: 1>, scalar_prefetch = 0 : i64, scratch_operands = 0 : i64, tpu.core_type = #tpu.core_type<tc>, window_params = [{transform_indices = @transform_0, window_bounds = array<i64: 8, 16, 32>}, {pipeline_mode = #tpu.pipeline_mode<synchronous>, transform_indices = @transform_1, window_bounds = array<i64: 1, 32>}, {pipeline_mode = #tpu.pipeline_mode<synchronous>, transform_indices = @transform_2, window_bounds = array<i64: 1, 64>}, {pipeline_mode = #tpu.pipeline_mode<synchronous>, transform_indices = @transform_3, window_bounds = array<i64: 16, 64>}, {pipeline_mode = #tpu.pipeline_mode<synchronous>, transform_indices = @transform_4, window_bounds = array<i64: 32, 32>}, {pipeline_mode = #tpu.pipeline_mode<synchronous>, transform_indices = @transform_5, window_bounds = array<i64: 32, 64>}, {pipeline_mode = #tpu.pipeline_mode<synchronous>, transform_indices = @transform_6, window_bounds = array<i64: 32, 128>}, {pipeline_mode = #tpu.pipeline_mode<synchronous>, transform_indices = @transform_7, window_bounds = array<i64: 1, 128>}, {pipeline_mode = #tpu.pipeline_mode<synchronous>, transform_indices = @transform_8, window_bounds = array<i64: 32, 4>}, {pipeline_mode = #tpu.pipeline_mode<synchronous>, transform_indices = @transform_9, window_bounds = array<i64: 4, 32>}, {transform_indices = @transform_10, window_bounds = array<i64: 8, 128>}]} {
    %c0 = arith.constant 0 : index
    %c0_0 = arith.constant 0 : index
    %c0_1 = arith.constant 0 : index
    %0 = vector.load %arg1[%c0, %c0_0, %c0_1] : memref<8x16x32xf32, #tpu.memory_space<vmem>>, vector<8x16x32xf32>
    %cst = arith.constant dense<0.000000e+00> : vector<8x32xf32>
    %1 = vector.multi_reduction <add>, %0, %cst [1] : vector<8x16x32xf32> to vector<8x32xf32>
    %cst_2 = arith.constant 1.600000e+01 : f32
    %2 = vector.broadcast %cst_2 : f32 to vector<8x32xf32>
    %3 = arith.divf %1, %2 : vector<8x32xf32>
    %c0_3 = arith.constant 0 : index
    %c0_4 = arith.constant 0 : index
    %4 = vector.load %arg5[%c0_3, %c0_4] : memref<32x32xf32, #tpu.memory_space<vmem>>, vector<32x32xf32>
    %cst_5 = arith.constant dense<0.000000e+00> : vector<8x32xf32>
    %5 = tpu.matmul %3, %4, %cst_5 {dimension_numbers = #tpu.dot_dimension_numbers<[1], [0], [0], [1], [0, 0, 1, 1], [], []>} : vector<8x32xf32>, vector<32x32xf32>, vector<8x32xf32> -> vector<8x32xf32>
    %c0_6 = arith.constant 0 : index
    %c0_7 = arith.constant 0 : index
    %6 = vector.load %arg2[%c0_6, %c0_7] : memref<1x32xf32, #tpu.memory_space<vmem>>, vector<1x32xf32>
    %7 = vector.broadcast %6 : vector<1x32xf32> to vector<8x32xf32>
    %8 = arith.addf %5, %7 : vector<8x32xf32>
    %c0_8 = arith.constant 0 : index
    %c0_9 = arith.constant 0 : index
    %9 = vector.load %arg6[%c0_8, %c0_9] : memref<32x64xf32, #tpu.memory_space<vmem>>, vector<32x64xf32>
    %cst_10 = arith.constant dense<0.000000e+00> : vector<8x64xf32>
    %10 = tpu.matmul %3, %9, %cst_10 {dimension_numbers = #tpu.dot_dimension_numbers<[1], [0], [0], [1], [0, 0, 1, 1], [], []>} : vector<8x32xf32>, vector<32x64xf32>, vector<8x64xf32> -> vector<8x64xf32>
    %c0_11 = arith.constant 0 : index
    %c0_12 = arith.constant 0 : index
    %11 = vector.load %arg3[%c0_11, %c0_12] : memref<1x64xf32, #tpu.memory_space<vmem>>, vector<1x64xf32>
    %12 = vector.broadcast %11 : vector<1x64xf32> to vector<8x64xf32>
    %13 = arith.addf %10, %12 : vector<8x64xf32>
    %14 = vector.extract_strided_slice %13 {offsets = [0, 0], sizes = [8, 32], strides = [1, 1]} : vector<8x64xf32> to vector<8x32xf32>
    %15 = vector.extract_strided_slice %13 {offsets = [0, 32], sizes = [8, 32], strides = [1, 1]} : vector<8x64xf32> to vector<8x32xf32>
    %16 = vector.shape_cast %0 : vector<8x16x32xf32> to vector<128x32xf32>
    %c0_13 = arith.constant 0 : index
    %c0_14 = arith.constant 0 : index
    %17 = vector.load %arg6[%c0_13, %c0_14] : memref<32x64xf32, #tpu.memory_space<vmem>>, vector<32x64xf32>
    %cst_15 = arith.constant dense<0.000000e+00> : vector<128x64xf32>
    %18 = tpu.matmul %16, %17, %cst_15 {dimension_numbers = #tpu.dot_dimension_numbers<[1], [0], [0], [1], [0, 0, 1, 1], [], []>} : vector<128x32xf32>, vector<32x64xf32>, vector<128x64xf32> -> vector<128x64xf32>
    %19 = vector.shape_cast %18 : vector<128x64xf32> to vector<8x16x64xf32>
    %c0_16 = arith.constant 0 : index
    %c0_17 = arith.constant 0 : index
    %20 = vector.load %arg4[%c0_16, %c0_17] : memref<16x64xf32, #tpu.memory_space<vmem>>, vector<16x64xf32>
    %21 = vector.shape_cast %20 : vector<16x64xf32> to vector<1x16x64xf32>
    %22 = vector.broadcast %21 : vector<1x16x64xf32> to vector<8x16x64xf32>
    %23 = arith.addf %19, %22 : vector<8x16x64xf32>
    %24 = vector.extract_strided_slice %23 {offsets = [0, 0, 0], sizes = [8, 16, 32], strides = [1, 1, 1]} : vector<8x16x64xf32> to vector<8x16x32xf32>
    %25 = vector.extract_strided_slice %23 {offsets = [0, 0, 32], sizes = [8, 16, 32], strides = [1, 1, 1]} : vector<8x16x64xf32> to vector<8x16x32xf32>
    %26 = arith.mulf %8, %14 : vector<8x32xf32>
    %c0_18 = arith.constant 0 : index
    %c0_19 = arith.constant 0 : index
    %27 = vector.load %arg9[%c0_18, %c0_19] : memref<32x4xf32, #tpu.memory_space<vmem>>, vector<32x4xf32>
    %cst_20 = arith.constant dense<0.000000e+00> : vector<8x4xf32>
    %28 = tpu.matmul %26, %27, %cst_20 {dimension_numbers = #tpu.dot_dimension_numbers<[1], [0], [0], [1], [0, 0, 1, 1], [], []>} : vector<8x32xf32>, vector<32x4xf32>, vector<8x4xf32> -> vector<8x4xf32>
    %29 = vector.shape_cast %8 : vector<8x32xf32> to vector<8x1x32xf32>
    %30 = vector.broadcast %29 : vector<8x1x32xf32> to vector<8x16x32xf32>
    %31 = arith.mulf %24, %30 : vector<8x16x32xf32>
    %32 = vector.shape_cast %31 : vector<8x16x32xf32> to vector<128x32xf32>
    %c0_21 = arith.constant 0 : index
    %c0_22 = arith.constant 0 : index
    %33 = vector.load %arg9[%c0_21, %c0_22] : memref<32x4xf32, #tpu.memory_space<vmem>>, vector<32x4xf32>
    %cst_23 = arith.constant dense<0.000000e+00> : vector<128x4xf32>
    %34 = tpu.matmul %32, %33, %cst_23 {dimension_numbers = #tpu.dot_dimension_numbers<[1], [0], [0], [1], [0, 0, 1, 1], [], []>} : vector<128x32xf32>, vector<32x4xf32>, vector<128x4xf32> -> vector<128x4xf32>
    %35 = vector.shape_cast %34 : vector<128x4xf32> to vector<8x16x4xf32>
    %cst_24 = arith.constant dense<0xFF800000> : vector<8x4xf32>
    %36 = vector.multi_reduction <maximumf>, %35, %cst_24 [1] : vector<8x16x4xf32> to vector<8x4xf32>
    %37 = arith.maximumf %28, %36 : vector<8x4xf32>
    %38 = arith.subf %28, %37 : vector<8x4xf32>
    %39 = math.exp %38 : vector<8x4xf32>
    %40 = vector.shape_cast %37 : vector<8x4xf32> to vector<8x1x4xf32>
    %41 = vector.broadcast %40 : vector<8x1x4xf32> to vector<8x16x4xf32>
    %42 = arith.subf %35, %41 : vector<8x16x4xf32>
    %43 = math.exp %42 : vector<8x16x4xf32>
    %cst_25 = arith.constant dense<0.000000e+00> : vector<8x4xf32>
    %44 = vector.multi_reduction <add>, %43, %cst_25 [1] : vector<8x16x4xf32> to vector<8x4xf32>
    %45 = arith.addf %39, %44 : vector<8x4xf32>
    %46 = tpu.reciprocal %45 {approx = true} : vector<8x4xf32> -> vector<8x4xf32>
    %47 = arith.mulf %45, %46 : vector<8x4xf32>
    %cst_26 = arith.constant 2.000000e+00 : f32
    %48 = vector.broadcast %cst_26 : f32 to vector<8x4xf32>
    %49 = arith.subf %48, %47 : vector<8x4xf32>
    %50 = arith.mulf %46, %49 : vector<8x4xf32>
    %c0_27 = arith.constant 0 : index
    %c0_28 = arith.constant 0 : index
    %51 = vector.load %arg10[%c0_27, %c0_28] : memref<4x32xf32, #tpu.memory_space<vmem>>, vector<4x32xf32>
    %cst_29 = arith.constant dense<0.000000e+00> : vector<8x32xf32>
    %52 = tpu.matmul %39, %51, %cst_29 {dimension_numbers = #tpu.dot_dimension_numbers<[1], [0], [0], [1], [0, 0, 1, 1], [], []>} : vector<8x4xf32>, vector<4x32xf32>, vector<8x32xf32> -> vector<8x32xf32>
    %53 = vector.shape_cast %43 : vector<8x16x4xf32> to vector<128x4xf32>
    %c0_30 = arith.constant 0 : index
    %c0_31 = arith.constant 0 : index
    %54 = vector.load %arg10[%c0_30, %c0_31] : memref<4x32xf32, #tpu.memory_space<vmem>>, vector<4x32xf32>
    %cst_32 = arith.constant dense<0.000000e+00> : vector<128x32xf32>
    %55 = tpu.matmul %53, %54, %cst_32 {dimension_numbers = #tpu.dot_dimension_numbers<[1], [0], [0], [1], [0, 0, 1, 1], [], []>} : vector<128x4xf32>, vector<4x32xf32>, vector<128x32xf32> -> vector<128x32xf32>
    %56 = vector.shape_cast %55 : vector<128x32xf32> to vector<8x16x32xf32>
    %57 = arith.mulf %52, %15 : vector<8x32xf32>
    %58 = arith.mulf %56, %25 : vector<8x16x32xf32>
    %cst_33 = arith.constant dense<0.000000e+00> : vector<8x32xf32>
    %59 = vector.multi_reduction <add>, %58, %cst_33 [1] : vector<8x16x32xf32> to vector<8x32xf32>
    %60 = arith.addf %57, %59 : vector<8x32xf32>
    %c0_34 = arith.constant 0 : index
    %c0_35 = arith.constant 0 : index
    %61 = vector.load %arg10[%c0_34, %c0_35] : memref<4x32xf32, #tpu.memory_space<vmem>>, vector<4x32xf32>
    %cst_36 = arith.constant dense<0.000000e+00> : vector<8x32xf32>
    %62 = tpu.matmul %50, %61, %cst_36 {dimension_numbers = #tpu.dot_dimension_numbers<[1], [0], [0], [1], [0, 0, 1, 1], [], []>} : vector<8x4xf32>, vector<4x32xf32>, vector<8x32xf32> -> vector<8x32xf32>
    %63 = arith.mulf %60, %62 : vector<8x32xf32>
    %c0_37 = arith.constant 0 : index
    %c0_38 = arith.constant 0 : index
    %64 = vector.load %arg7[%c0_37, %c0_38] : memref<32x128xf32, #tpu.memory_space<vmem>>, vector<32x128xf32>
    %cst_39 = arith.constant dense<0.000000e+00> : vector<8x128xf32>
    %65 = tpu.matmul %63, %64, %cst_39 {dimension_numbers = #tpu.dot_dimension_numbers<[1], [0], [0], [1], [0, 0, 1, 1], [], []>} : vector<8x32xf32>, vector<32x128xf32>, vector<8x128xf32> -> vector<8x128xf32>
    %c0_40 = arith.constant 0 : index
    %c0_41 = arith.constant 0 : index
    %66 = vector.load %arg8[%c0_40, %c0_41] : memref<1x128xf32, #tpu.memory_space<vmem>>, vector<1x128xf32>
    %67 = vector.broadcast %66 : vector<1x128xf32> to vector<8x128xf32>
    %68 = arith.addf %65, %67 : vector<8x128xf32>
    %c0_42 = arith.constant 0 : index
    %c0_43 = arith.constant 0 : index
    %69 = vector.load %arg11[%c0_42, %c0_43] : memref<8x128xf32, #tpu.memory_space<vmem>>, vector<8x128xf32>
    tpu.vector_store %arg11[%c0_42, %c0_43], %68 {strides = array<i32>} : memref<8x128xf32, #tpu.memory_space<vmem>>, vector<8x128xf32>,
    return
  }
  func.func @transform_0(%arg0: i32) -> (i32, i32, i32) {
    %c0_i32 = arith.constant 0 : i32
    %c0_i32_0 = arith.constant 0 : i32
    %c0_i32_1 = arith.constant 0 : i32
    return %arg0, %c0_i32, %c0_i32_0 : i32, i32, i32
  }
  func.func @transform_1(%arg0: i32) -> (i32, i32) {
    %c0_i32 = arith.constant 0 : i32
    %c0_i32_0 = arith.constant 0 : i32
    %c0_i32_1 = arith.constant 0 : i32
    return %c0_i32, %c0_i32_0 : i32, i32
  }
  func.func @transform_2(%arg0: i32) -> (i32, i32) {
    %c0_i32 = arith.constant 0 : i32
    %c0_i32_0 = arith.constant 0 : i32
    %c0_i32_1 = arith.constant 0 : i32
    return %c0_i32, %c0_i32_0 : i32, i32
  }
  func.func @transform_3(%arg0: i32) -> (i32, i32) {
    %c0_i32 = arith.constant 0 : i32
    %c0_i32_0 = arith.constant 0 : i32
    %c0_i32_1 = arith.constant 0 : i32
    return %c0_i32, %c0_i32_0 : i32, i32
  }
  func.func @transform_4(%arg0: i32) -> (i32, i32) {
    %c0_i32 = arith.constant 0 : i32
    %c0_i32_0 = arith.constant 0 : i32
    %c0_i32_1 = arith.constant 0 : i32
    return %c0_i32, %c0_i32_0 : i32, i32
  }
  func.func @transform_5(%arg0: i32) -> (i32, i32) {
    %c0_i32 = arith.constant 0 : i32
    %c0_i32_0 = arith.constant 0 : i32
    %c0_i32_1 = arith.constant 0 : i32
    return %c0_i32, %c0_i32_0 : i32, i32
  }
  func.func @transform_6(%arg0: i32) -> (i32, i32) {
    %c0_i32 = arith.constant 0 : i32
    %c0_i32_0 = arith.constant 0 : i32
    %c0_i32_1 = arith.constant 0 : i32
    return %c0_i32, %c0_i32_0 : i32, i32
  }
  func.func @transform_7(%arg0: i32) -> (i32, i32) {
    %c0_i32 = arith.constant 0 : i32
    %c0_i32_0 = arith.constant 0 : i32
    %c0_i32_1 = arith.constant 0 : i32
    return %c0_i32, %c0_i32_0 : i32, i32
  }
  func.func @transform_8(%arg0: i32) -> (i32, i32) {
    %c0_i32 = arith.constant 0 : i32
    %c0_i32_0 = arith.constant 0 : i32
    %c0_i32_1 = arith.constant 0 : i32
    return %c0_i32, %c0_i32_0 : i32, i32
  }
  func.func @transform_9(%arg0: i32) -> (i32, i32) {
    %c0_i32 = arith.constant 0 : i32
    %c0_i32_0 = arith.constant 0 : i32
    %c0_i32_1 = arith.constant 0 : i32
    return %c0_i32, %c0_i32_0 : i32, i32
  }
  func.func @transform_10(%arg0: i32) -> (i32, i32) {
    %c0_i32 = arith.constant 0 : i32
    %c0_i32_0 = arith.constant 0 : i32
    return %arg0, %c0_i32 : i32, i32
  }
}

</mosaic_0001>

<bundles_post_ra>
// kernel: tpu_custom_call.1
= control target key start
LH: loop header
LB: loop body
LE: loop exit
PB: predicated region body
PF: predicated region fallthrough
CT: control target
= control target key end

     0   :  { %15 = vsyncpa [#allocation3], 0  ;;  %s2955_s0 = inlined_call_operand.hbm [shape: f32[8,16,32], index: 0, kind: input, shape index: {}]   ;;  %s2956_s1 = inlined_call_operand.vmem [shape: f32[1,32], index: 1, kind: input, shape index: {}]   ;;  %s2957_s2 = inlined_call_operand.vmem [shape: f32[1,64], index: 2, kind: input, shape index: {}]   ;;  %s2958_s3 = inlined_call_operand.hbm [shape: f32[16,64], index: 3, kind: input, shape index: {}]   ;;  %s2959_s4 = inlined_call_operand.vmem [shape: f32[32,32], index: 4, kind: input, shape index: {}]   ;;  %s2960_s5 = inlined_call_operand.hbm [shape: f32[32,64], index: 5, kind: input, shape index: {}]   ;;  %s2961_s6 = inlined_call_operand.hbm [shape: f32[32,128], index: 6, kind: input, shape index: {}]   ;;  %s2962_s7 = inlined_call_operand.vmem [shape: f32[1,128], index: 7, kind: input, shape index: {}]   ;;  %s2963_s8 = inlined_call_operand.vmem [shape: f32[32,4], index: 8, kind: input, shape index: {}]   ;;  %s2964_s9 = inlined_call_operand.vmem [shape: f32[4,32], index: 9, kind: input, shape index: {}]   ;;  %s2965_s10 = inlined_call_operand.hbm [shape: f32[8,128], index: 10, kind: output, shape index: {}]  }
   0x1   :  { %16 = vsyncpa [#allocation6], 0 }
   0x2   :  { %17 = vsyncpa [#allocation9], 0 }
   0x3   :  { %18 = vsyncpa [#allocation4], 0  ;;  %s2348_s13 = smov [#allocation5]   ;;  %s2349_s15 = smov [#allocation2]  }
   0x4   :  { %s40_s14 = sshll.u32 %s2348_s13, 4  ;;  %s24_s16 = sshll.u32 %s2349_s15, 4  ;;  %s41_s14 = int_to_ptr.vmem [resolvable:$true] %s40_s14  ;;  %s25_s16 = int_to_ptr.vmem [resolvable:$true] %s24_s16 }
   0x5   :  { %s2248_s17 = scalar_lea.vmem %s41_s14, 256  ;;  %p2253_p1 = scmp.lt.s32.totalorder %s41_s14, %s41_s14 }
   0x6   :  { %p2249_p0 = scmp.ne.s32.totalorder %s41_s14, %s2248_s17  ;;  %p2254_p2 = scmp.lt.s32.totalorder %s2248_s17, %s2248_s17 }
   0x8   :  { %p2255_p3 = por %p2254_p2, %p2253_p1 }
   0xa   :  { %p2256_p4 = pnand %p2255_p3, %p2249_p0 }
   0xc   :  { %2259 = shalt.err (!%p2256_p4)
}
   0xd   :  { %s2350_s18 = smov 128   ;;  %s2351_s19 = smov 8  }
   0xe   :  { %46 = dma.hbm_to_vmem [thread:$0]  %s2958_s3, 256, %s41_s14, [#allocation6], %s2350_s18, %s2350_s18, %s2351_s19  }
   0xf   :  { %s2268_s22 = scalar_lea.vmem %s25_s16, 2048  ;;  %p2273_p6 = scmp.lt.s32.totalorder %s25_s16, %s25_s16 }
  0x10   :  { %p2269_p5 = scmp.ne.s32.totalorder %s25_s16, %s2268_s22  ;;  %p2274_p7 = scmp.lt.s32.totalorder %s2268_s22, %s2268_s22 }
  0x12   :  { %p2275_p8 = por %p2274_p7, %p2273_p6 }
  0x14   :  { %p2276_p9 = pnand %p2275_p8, %p2269_p5 }
  0x16   :  { %2279 = shalt.err (!%p2276_p9)
}
  0x17   :  { %30 = dma.hbm_to_vmem [thread:$0]  %s2955_s0, 2048, %s25_s16, [#allocation3], %s2350_s18, %s2350_s18, %s2351_s19  }
  0x18   :  { %s2352_s25 = smov [#allocation7]   ;;  %s2353_s27 = smov [#allocation8]  }
  0x19   :  { %s54_s26 = sshll.u32 %s2352_s25, 4  ;;  %s66_s28 = sshll.u32 %s2353_s27, 4  ;;  %s55_s26 = int_to_ptr.vmem [resolvable:$true] %s54_s26  ;;  %s67_s28 = int_to_ptr.vmem [resolvable:$true] %s66_s28 }
  0x1a   :  { %s2288_s3 = scalar_lea.vmem %s55_s26, 512  ;;  %p2293_p11 = scmp.lt.s32.totalorder %s55_s26, %s55_s26 }
  0x1b   :  { %p2289_p10 = scmp.ne.s32.totalorder %s55_s26, %s2288_s3  ;;  %p2294_p12 = scmp.lt.s32.totalorder %s2288_s3, %s2288_s3 }
  0x1d   :  { %p2295_p13 = por %p2294_p12, %p2293_p11 }
  0x1f   :  { %p2296_p0 = pnand %p2295_p13, %p2289_p10 }
  0x21   :  { %2299 = shalt.err (!%p2296_p0)
}
  0x22   :  { %60 = dma.hbm_to_vmem [thread:$0]  %s2960_s5, 512, %s55_s26, [#allocation6], %s2350_s18, %s2350_s18, %s2351_s19  }
  0x23   :  { %s2308_s0 = scalar_lea.vmem %s67_s28, 512  ;;  %p2313_p2 = scmp.lt.s32.totalorder %s67_s28, %s67_s28 }
  0x24   :  { %p2309_p1 = scmp.ne.s32.totalorder %s67_s28, %s2308_s0  ;;  %p2314_p3 = scmp.lt.s32.totalorder %s2308_s0, %s2308_s0 }
  0x26   :  { %p2315_p4 = por %p2314_p3, %p2313_p2 }
  0x28   :  { %p2316_p5 = pnand %p2315_p4, %p2309_p1 }
  0x2a   :  { %2319 = shalt.err (!%p2316_p5)
}
  0x2b   :  { %72 = dma.hbm_to_vmem [thread:$0]  %s2961_s6, 512, %s67_s28, [#allocation9], %s2350_s18, %s2350_s18, %s2351_s19  }
  0x2c   :  { %2340 = dma.done.wait [#allocation3], 2048  }
  0x2d   :  { %2341 = vsyncadd [#allocation3], 4294965248 }
  0x2e   :  { %2342 = dma.done.wait [#allocation6], 768  }
  0x2f   :  { %2343 = vsyncadd [#allocation6], 4294966528 }
  0x30   :  { %2344 = dma.done.wait [#allocation9], 512  }
  0x31   :  { %2345 = vsyncadd [#allocation9], 4294966784  ;;  %v2354_v0 = vmov 0.0   ;;  %vm2355_vm0 = vmmov 0   ;;  %vm107_vm1 = vcmask 261120   ;;  %v2441_v1 = vld [vmem:[#allocation7 + $0x18] sm:$0xff] }
  0x32   :  { %2049 = vmatprep.subr.mxu1 %v2354_v0  ;;  %2057 = vmatprep.mubr.msk.f32.mxu1 %vm2355_vm0, %v2354_v0  ;;  %v2443_v2 = vld [vmem:[#allocation7 + $0x10] sm:$0xff]  ;;  %v2446_v3 = vld [vmem:[#allocation7 + $0x8] sm:$0xff]  ;;  %v92_v5 = vld [vmem:[#allocation2 + $0x8] sm:$0xff]  ;;  %vm208_vm2 = vcmask 1041409   ;;  %vm210_vm3 = vcmask 1042434   ;;  %vm212_vm4 = vcmask 1043459  }
  0x33   :  { %2071 = vmatprep.subr.mxu0 %v2441_v1  ;;  %v91_v4 = vld [vmem:[#allocation2] sm:$0xff]  ;;  %v109_v7 = vsel %vm107_vm1, %v92_v5, 0.0  ;;  %v93_v8 = vld [vmem:[#allocation2 + $0x10] sm:$0xff]  ;;  %v2452_v9 = vld [vmem:[#allocation2 + $0x18] sm:$0xff]  ;;  %vm214_vm5 = vcmask 1044484   ;;  %vm216_vm6 = vcmask 1045509  }
  0x34   :  { %2072 = vmatpush3.msra.mxu0 %v2441_v1  ;;  %v108_v6 = vsel %vm107_vm1, %v91_v4, 0.0  ;;  %2079 = vmatprep.mubr.msk.f32.mxu0 %vm107_vm1, %v91_v4  ;;  %v2454_v10 = vld [vmem:[#allocation2 + $0x20] sm:$0xff]  ;;  %v117_v12 = vsel %vm107_vm1, %v93_v8, 0.0  ;;  %v118_v13 = vsel %vm107_vm1, %v2452_v9, 0.0  ;;  %v192_v15 = vld [vmem:[%s2959_s4 + $0x18] sm:$0xff]  ;;  %v2465_v16 = vld [vmem:[#allocation2 + $0x28] sm:$0xff] }
  0x35   :  { %2073 = vmatprep.subr.mxu0 %v2443_v2  ;;  %v110_v11 = vadd.f32 %v109_v7, %v108_v6  ;;  %v126_v14 = vsel %vm107_vm1, %v2454_v10, 0.0  ;;  %v191_v17 = vld [vmem:[%s2959_s4 + $0x10] sm:$0xff]  ;;  %v119_v19 = vadd.f32 %v118_v13, %v117_v12  ;;  %2050 = vmatpush3.msra.mxu1 %v192_v15  ;;  %v127_v20 = vsel %vm107_vm1, %v2465_v16, 0.0  ;;  %v2477_v22 = vld [vmem:[#allocation2 + $0x38] sm:$0xff]  ;;  %v190_v26 = vld [vmem:[%s2959_s4 + $0x8] sm:$0xff]  ;;  %s2356_s26 = smov 96  }
  0x36   :  { %2074 = vmatpush3.msra.mxu0 %v2443_v2  ;;  %v2471_v18 = vld [vmem:[#allocation7] sm:$0xff]  ;;  %v128_v24 = vadd.f32 %v127_v20, %v126_v14  ;;  %2051 = vmatprep.subr.mxu1 %v2354_v0  ;;  %v136_v27 = vsel %vm107_vm1, %v2477_v22, 0.0  ;;  %v2488_v28 = vld [vmem:[#allocation2 + $0x40] sm:$0xff]  ;;  %v2490_v29 = vld [vmem:[#allocation2 + $0x48] sm:$0xff]  ;;  %vm218_vm7 = vcmask 1046534   ;;  %vm220_vm8 = vcmask 1047559  }
  0x37   :  { %v2475_v21 = vld [vmem:[#allocation2 + $0x30] sm:$0xff]  ;;  %2075 = vmatprep.subr.mxu0 %v2446_v3  ;;  %v111_v23 = vrot.slane %v110_v11, 4  ;;  %v120_v30 = vrot.slane %v119_v19, 4  ;;  %2052 = vmatpush3.msra.mxu1 %v191_v17  ;;  %v144_v32 = vsel %vm107_vm1, %v2488_v28, 0.0  ;;  %v145_v33 = vsel %vm107_vm1, %v2490_v29, 0.0  ;;  %v2499_v35 = vld [vmem:[#allocation2 + $0x58] sm:$0xff] }
  0x38   :  { %v135_v25 = vsel %vm107_vm1, %v2475_v21, 0.0  ;;  %2076 = vmatpush3.msra.mxu0 %v2446_v3  ;;  %v2497_v34 = vld [vmem:[#allocation2 + $0x50] sm:$0xff]  ;;  %v2501_v36 = vld [vmem:[#allocation2 + $0x60] sm:$0xff]  ;;  %v129_v38 = vrot.slane %v128_v24, 4  ;;  %2053 = vmatprep.subr.mxu1 %v2354_v0  ;;  %v146_v40 = vadd.f32 %v145_v33, %v144_v32  ;;  %v2508_v41 = vld [vmem:[#allocation2 + $0x68] sm:$0xff]  ;;  %v154_v46 = vsel %vm107_vm1, %v2499_v35, 0.0 }
  0x39   :  { %v137_v31 = vadd.f32 %v136_v27, %v135_v25  ;;  %2077 = vmatprep.subr.mxu0 %v2471_v18  ;;  %v112_v37 = vadd.f32 %v111_v23, %v110_v11  ;;  %v189_v39 = vld [vmem:[%s2959_s4] sm:$0xff]  ;;  %v2510_v42 = vld [vmem:[#allocation2 + $0x70] sm:$0xff]  ;;  %v153_v43 = vsel %vm107_vm1, %v2497_v34, 0.0  ;;  %v121_v44 = vadd.f32 %v120_v30, %v119_v19  ;;  %2054 = vmatpush3.msra.mxu1 %v190_v26  ;;  %v2521_v51 = vld [vmem:[#allocation2 + $0x78] sm:$0xff]  ;;  %s2358_s30 = smov [#allocation10]  }
  0x3a   :  { %2078 = vmatpush3.msra.mxu0 %v2471_v18  ;;  %v162_v47 = vsel %vm107_vm1, %v2501_v36, 0.0  ;;  %v130_v49 = vadd.f32 %v129_v38, %v128_v24  ;;  %2055 = vmatprep.subr.mxu1 %v2354_v0  ;;  %v147_v50 = vrot.slane %v146_v40, 4  ;;  %v155_v52 = vadd.f32 %v154_v46, %v153_v43  ;;  %s1897_s0 = sshll.u32 %s2358_s30, 4  ;;  %s1898_s0 = int_to_ptr.vmem [resolvable:$true] %s1897_s0 }
  0x3b   :  { %v138_v45 = vrot.slane %v137_v31, 4  ;;  %v113_v48 = vrot.slane %v112_v37, 2  ;;  %2080 = vmatmul.mubr.msk.f32.vlgmr.msra.gmra.mxu0 %vm107_vm1, %v92_v5  ;;  %v122_v53 = vrot.slane %v121_v44, 2  ;;  %2056 = vmatpush3.msra.mxu1 %v189_v39  ;;  %v163_v55 = vsel %vm107_vm1, %v2508_v41, 0.0  ;;  %s2320_s11 = scalar_lea.vmem %s1898_s0, 128  ;;  %p2325_p7 = scmp.lt.s32.totalorder %s1898_s0, %s1898_s0 }
  0x3c   :  { %2082 = vmatprep.mubr.msk.f32.mxu0 %vm107_vm1, %v93_v8  ;;  %v171_v56 = vsel %vm107_vm1, %v2510_v42, 0.0  ;;  %v131_v58 = vrot.slane %v130_v49, 2  ;;  %2060 = vmatprep.subr.mxu1 %v2354_v0  ;;  %v148_v59 = vadd.f32 %v147_v50, %v146_v40  ;;  %v156_v60 = vrot.slane %v155_v52, 4  ;;  %p2321_p6 = scmp.ne.s32.totalorder %s1898_s0, %s2320_s11  ;;  %p2326_p8 = scmp.lt.s32.totalorder %s2320_s11, %s2320_s11 }
  0x3d   :  { %v139_v54 = vadd.f32 %v138_v45, %v137_v31  ;;  %v114_v57 = vadd.f32 %v113_v48, %v112_v37  ;;  %2146 = vmatprep.subr.mxu0 %v2354_v0  ;;  %v123_v61 = vadd.f32 %v122_v53, %v121_v44  ;;  %v164_v63 = vadd.f32 %v163_v55, %v162_v47 }
  0x3e   :  { %v172_v4 = vsel %vm107_vm1, %v2521_v51, 0.0  ;;  %v132_v6 = vadd.f32 %v131_v58, %v130_v49  ;;  %v149_v7 = vrot.slane %v148_v59, 2  ;;  %v157_v8 = vadd.f32 %v156_v60, %v155_v52  ;;  %p2327_p9 = por %p2326_p8, %p2325_p7 }
  0x3f   :  { %v140_v62 = vrot.slane %v139_v54, 2  ;;  %v115_v5 = vrot.slane %v114_v57, 1  ;;  %2083 = vmatmul.mubr.msk.f32.gmra.mxu0 %vm107_vm1, %v2452_v9  ;;  %v124_v11 = vrot.slane %v123_v61, 1  ;;  %v165_v13 = vrot.slane %v164_v63, 4 }
  0x40   :  { %2085 = vmatprep.mubr.msk.f32.mxu0 %vm107_vm1, %v2454_v10  ;;  %v173_v14 = vadd.f32 %v172_v4, %v171_v56  ;;  %v133_v17 = vrot.slane %v132_v6, 1  ;;  %v150_v19 = vadd.f32 %v149_v7, %v148_v59  ;;  %v158_v20 = vrot.slane %v157_v8, 2  ;;  %p2328_p10 = pnand %p2327_p9, %p2321_p6 }
  0x41   :  { %v141_v12 = vadd.f32 %v140_v62, %v139_v54  ;;  %v116_v15 = vadd.f32 %v115_v5, %v114_v57  ;;  %v125_v23 = vadd.f32 %v124_v11, %v123_v61  ;;  %v166_v25 = vadd.f32 %v165_v13, %v164_v63 }
  0x42   :  { %v174_v26 = vrot.slane %v173_v14, 4  ;;  %v134_v9 = vadd.f32 %v133_v17, %v132_v6  ;;  %v151_v30 = vrot.slane %v150_v19, 1  ;;  %v159_v31 = vadd.f32 %v158_v20, %v157_v8 }
  0x43   :  { %v142_v24 = vrot.slane %v141_v12, 1  ;;  %v181_v27 = vmul.f32 0.0625, %v116_v15  ;;  %2086 = vmatmul.mubr.msk.f32.gmra.mxu0 %vm107_vm1, %v2465_v16  ;;  %v182_v32 = vmul.f32 0.0625, %v125_v23  ;;  %v167_v33 = vrot.slane %v166_v25, 2 }
  0x44   :  { %2088 = vmatprep.mubr.msk.f32.mxu0 %vm107_vm1, %v2475_v21  ;;  %v175_v37 = vadd.f32 %v174_v26, %v173_v14  ;;  %v183_v38 = vmul.f32 0.0625, %v134_v9  ;;  %v152_v39 = vadd.f32 %v151_v30, %v150_v19  ;;  %v160_v40 = vrot.slane %v159_v31, 1 }
  0x45   :  { %v143_v10 = vadd.f32 %v142_v24, %v141_v12  ;;  %v209_v43 = vsel %vm208_vm2, %v182_v32, %v181_v27  ;;  %v168_v45 = vadd.f32 %v167_v33, %v166_v25  ;;  %v2357_v8 = vmov 1966171168   ;;  %v1908_v25 = vld [vmem:[%s2956_s1] ss:$0 sm:$0xff] }
  0x46   :  { %v176_v46 = vrot.slane %v175_v37, 2  ;;  %v185_v16 = vmul.f32 0.0625, %v152_v39  ;;  %v161_v47 = vadd.f32 %v160_v40, %v159_v31  ;;  %v211_v48 = vsel %vm210_vm3, %v183_v38, %v209_v43 }
  0x47   :  { %v184_v44 = vmul.f32 0.0625, %v143_v10  ;;  %2089 = vmatmul.mubr.msk.f32.gmra.mxu0 %vm107_vm1, %v2477_v22  ;;  %v169_v21 = vrot.slane %v168_v45, 1  ;;  %v667_v11 = vunpack.c.l.s4 %v2357_v8  ;;  %v669_v12 = vlaneseq }
  0x48   :  { %2091 = vmatprep.mubr.msk.f32.mxu0 %vm107_vm1, %v2488_v28  ;;  %v177_v49 = vadd.f32 %v176_v46, %v175_v37  ;;  %v186_v52 = vmul.f32 0.0625, %v161_v47  ;;  %v1910_v46 = vld [vmem:[%s2957_s2] ss:$0 sm:$0xff]  ;;  %vm1291_vm9 = vcmask 1043456   ;;  %vm963_vm10 = vcmask 31744  }
  0x49   :  { %v213_v50 = vsel %vm212_vm4, %v184_v44, %v211_v48  ;;  %v170_v54 = vadd.f32 %v169_v21, %v168_v45  ;;  %v668_v19 = vunpack.c.0.s8 %v667_v11  ;;  %v670_v20 = vshrl.u32 %v669_v12, 7 }
  0x4a   :  { %v215_v53 = vsel %vm214_vm5, %v185_v16, %v213_v50  ;;  %v178_v55 = vrot.slane %v177_v49, 1 }
  0x4b   :  { %v217_v56 = vsel %vm216_vm6, %v186_v52, %v215_v53  ;;  %2092 = vmatmul.mubr.msk.f32.gmra.mxu0 %vm107_vm1, %v2490_v29  ;;  %v187_v57 = vmul.f32 0.0625, %v170_v54  ;;  %v2609_v29 = vld [vmem:[#allocation5 + $0x8] sm:$0xff]  ;;  %v2659_v27 = vsub.s32 %v668_v19, %v670_v20  ;;  %v2678_v44 = vsub.s32 0, %v670_v20 }
  0x4c   :  { %v179_v22 = vadd.f32 %v178_v55, %v177_v49  ;;  %2094 = vmatprep.mubr.msk.f32.mxu0 %vm107_vm1, %v2497_v34 }
  0x4d   :  { %v219_v58 = vsel %vm218_vm7, %v187_v57, %v217_v56 }
  0x4e   :  { %v188_v28 = vmul.f32 0.0625, %v179_v22 }
  0x4f   :  { %2095 = vmatmul.mubr.msk.f32.gmra.mxu0 %vm107_vm1, %v2499_v35  ;;  %v2611_v35 = vld [vmem:[#allocation5] sm:$0xff] }
  0x50   :  { %v221_v59 = vsel %vm220_vm8, %v188_v28, %v219_v58  ;;  %2097 = vmatprep.mubr.msk.f32.mxu0 %vm107_vm1, %v2501_v36 }
  0x51   :  { %2058 = vmatmul.mubr.msk.f32.vlgmr.msra.gmra.mxu1 %vm107_vm1, %v221_v59 }
  0x52   :  { %2061 = vmatpush3.msra.mxu1 %v2441_v1  ;;  %2068 = vmatprep.mubr.msk.f32.mxu1 %vm2355_vm0, %v2354_v0  ;;  %v2584_v1 = vld [vmem:[%s2963_s8 + $0x18] sm:$0xff] }
  0x53   :  { %2062 = vmatprep.subr.mxu1 %v2354_v0  ;;  %2098 = vmatmul.mubr.msk.f32.gmra.mxu0 %vm107_vm1, %v2508_v41 }
  0x54   :  { %2063 = vmatpush3.msra.mxu1 %v2443_v2  ;;  %2100 = vmatprep.mubr.msk.f32.mxu0 %vm107_vm1, %v2510_v42  ;;  %v2591_v2 = vld [vmem:[%s2963_s8 + $0x10] sm:$0xff] }
  0x55   :  { %2064 = vmatprep.subr.mxu1 %v2354_v0 }
  0x56   :  { %2065 = vmatpush3.msra.mxu1 %v2446_v3  ;;  %v2598_v3 = vld [vmem:[%s2963_s8 + $0x8] sm:$0xff] }
  0x57   :  { %2066 = vmatprep.subr.mxu1 %v2354_v0  ;;  %2101 = vmatmul.mubr.msk.f32.gmra.mxu0 %vm107_vm1, %v2521_v51 }
  0x58   :  { %2067 = vmatpush3.msra.mxu1 %v2471_v18  ;;  %2148 = vmatprep.mubr.msk.f32.mxu0 %vm2355_vm0, %v2354_v0  ;;  %v2605_v18 = vld [vmem:[%s2963_s8] sm:$0xff] }
  0x59   :  { %2069 = vmatmul.mubr.msk.f32.vlgmr.msra.gmra.mxu1 %vm107_vm1, %v221_v59  ;;  %2103 = vmatprep.subr.mxu1 %v2354_v0 }
  0x5a   :  { %2111 = vmatprep.mubr.msk.f32.mxu1 %vm2355_vm0, %v2354_v0  ;;  %2104 = vmatpush3.msra.mxu1 %v2584_v1 }
  0x5b   :  { %2105 = vmatprep.subr.mxu1 %v2354_v0 }
  0x5c   :  { %2106 = vmatpush3.msra.mxu1 %v2591_v2 }
  0x5d   :  { %2107 = vmatprep.subr.mxu1 %v2354_v0 }
  0x5e   :  { %2108 = vmatpush3.msra.mxu1 %v2598_v3 }
  0x5f   :  { %2109 = vmatprep.subr.mxu1 %v2354_v0 }
  0x60   :  { %2110 = vmatpush3.msra.mxu1 %v2605_v18 }
  0x61   :  { %2114 = vmatprep.subr.mxu1 %v2584_v1 }
  0xfb   :  { %v2081_v34 = vpop.f32.mrf.mxu0 }
  0xfc   :  { %v2614_v36 = vadd.f32 %v2081_v34, %v2609_v29 }
  0xfd   :  { %v489_v41 = vpop.f32.mrf.mxu0 }
  0xfe   :  { %v2617_v42 = vadd.f32 %v2611_v35, %v489_v41  ;;  %1581 = vrot.lane.b32.xlu0 %v2614_v36, %s2356_s26 }
  0xff   :  { %v2084_v51 = vpop.f32.mrf.mxu0 }
 0x100   :  { %v2622_v60 = vadd.f32 %v2084_v51, %v2609_v29 }
 0x101   :  { %v499_v61 = vpop.f32.mrf.mxu0 }
 0x102   :  { %1579 = vrot.lane.b32.xlu0 %v2617_v42, %s2356_s26  ;;  %1585 = vrot.lane.b32.xlu1 %v2622_v60, %s2356_s26  ;;  %v2629_v63 = vadd.f32 %v2611_v35, %v499_v61 }
 0x103   :  { %v2087_v62 = vpop.f32.mrf.mxu0 }
 0x104   :  { %v2637_v7 = vadd.f32 %v2087_v62, %v2609_v29 }
 0x105   :  { %v509_v4 = vpop.f32.mrf.mxu0 }
 0x106   :  { %v2632_v5 = vadd.f32 %v2611_v35, %v509_v4  ;;  %1583 = vrot.lane.b32.xlu1 %v2629_v63, %s2356_s26 }
 0x107   :  { %v2090_v6 = vpop.f32.mrf.mxu0 }
 0x108   :  { %1587 = vrot.lane.b32.xlu0 %v2632_v5, %s2356_s26  ;;  %v2647_v17 = vadd.f32 %v2090_v6, %v2609_v29 }
 0x109   :  { %v519_v13 = vpop.f32.mrf.mxu0 }
 0x10a   :  { %v2642_v14 = vadd.f32 %v2611_v35, %v519_v13  ;;  %1589 = vrot.lane.b32.xlu1 %v2637_v7, %s2356_s26 }
 0x10b   :  { %v2093_v15 = vpop.f32.mrf.mxu0 }
 0x10c   :  { %1591 = vrot.lane.b32.xlu0 %v2642_v14, %s2356_s26  ;;  %v2662_v9 = vadd.f32 %v2093_v15, %v2609_v29 }
 0x10d   :  { %v529_v23 = vpop.f32.mrf.mxu0 }
 0x10e   :  { %v2652_v24 = vadd.f32 %v2611_v35, %v529_v23  ;;  %1593 = vrot.lane.b32.xlu1 %v2647_v17, %s2356_s26  ;;  %v2756_v23 = vld [vmem:[%s2964_s9] sm:$0xf] }
 0x10f   :  { %v2096_v26 = vpop.f32.mrf.mxu0  ;;  %2147 = vmatpush3.msk.msra.mxu0 %vm1291_vm9, %v2756_v23 }
 0x110   :  { %1595 = vrot.lane.b32.xlu0 %v2652_v24, %s2356_s26  ;;  %v2673_v39 = vadd.f32 %v2096_v26, %v2609_v29  ;;  %2151 = vmatprep.subr.msk.mxu0 %vm1291_vm9, %v2756_v23 }
 0x111   :  { %v290_v30 = vpop.f32.mrf.mxu1  ;;  %v539_v31 = vpop.f32.mrf.mxu0 }
 0x112   :  { %v291_v32 = vadd.f32 %v1908_v25, %v290_v30  ;;  %v2667_v10 = vadd.f32 %v2611_v35, %v539_v31  ;;  %1597 = vrot.lane.b32.xlu1 %v2662_v9, %s2356_s26 }
 0x113   :  { %v2059_v33 = vpop.f32.mrf.mxu1  ;;  %v2099_v37 = vpop.f32.mrf.mxu0 }
 0x114   :  { %v672_v38 = vrot.slane %v291_v32, %v2659_v27  ;;  %1599 = vrot.lane.b32.xlu0 %v2667_v10, %s2356_s26  ;;  %v2689_v47 = vadd.f32 %v2099_v37, %v2609_v29  ;;  %v665_v28 = vcombine.high %v291_v32, %v291_v32 }
 0x115   :  { %v549_v40 = vpop.f32.mrf.mxu0 }
 0x116   :  { %v688_v43 = vrot.slane %v672_v38, %v2659_v27  ;;  %v2681_v45 = vadd.f32 %v2611_v35, %v549_v40  ;;  %1601 = vrot.lane.b32.xlu1 %v2673_v39, %s2356_s26  ;;  %v680_v48 = vcombine.high %v672_v38, %v672_v38 }
 0x117   :  { %v2102_v16 = vpop.f32.mrf.mxu0 }
 0x118   :  { %1603 = vrot.lane.b32.xlu0 %v2681_v45, %s2356_s26  ;;  %v717_v50 = vrot.slane %v688_v43, %v2678_v44  ;;  %v585_v56 = vadd.f32 %v2102_v16, %v2609_v29  ;;  %v702_v22 = vrot.slane %v680_v48, %v2659_v27  ;;  %v710_v58 = vcombine.high %v688_v43, %v688_v43 }
 0x119   :  { %v371_v21 = vpop.f32.mrf.mxu1  ;;  %v559_v49 = vpop.f32.mrf.mxu0 }
 0x11a   :  { %v372_v52 = vadd.f32 %v1910_v46, %v371_v21  ;;  %1605 = vrot.lane.b32.xlu1 %v2689_v47, %s2356_s26  ;;  %v584_v54 = vadd.f32 %v2611_v35, %v559_v49  ;;  %v754_v57 = vmul.f32 %v717_v50, %v2617_v42  ;;  %v721_v59 = vrot.slane %v702_v22, %v2678_v44 }
 0x11b   :  { %v2070_v53 = vpop.f32.mrf.mxu1  ;;  %v755_v29 = vmul.f32 %v717_v50, %v2614_v36  ;;  %v712_v34 = vcombine.high %v702_v22, %v702_v22 }
 0x11c   :  { %v586_v55 = vmul.f32 %v372_v52, %v291_v32  ;;  %1607 = vrot.lane.b32.xlu0 %v584_v54, %s2356_s26  ;;  %v756_v35 = vmul.f32 %v721_v59, %v2629_v63 }
 0x11d   :  { %v729_v51 = vrot.slane %v712_v34, %v2678_v44 }
 0x11e   :  { %2112 = vmatmul.mubr.msk.f32.vlgmr.msra.gmra.mxu1 %vm107_vm1, %v586_v55  ;;  %1609 = vrot.lane.b32.xlu1 %v585_v56, %s2356_s26 }
 0x11f   :  { %2115 = vmatpush3.msra.mxu1 %v2584_v1  ;;  %2122 = vmatprep.mubr.msk.f32.mxu1 %vm107_vm1, %v754_v57  ;;  %v679_v1 = vrot.slane %v665_v28, %v2659_v27  ;;  %v760_v63 = vmul.f32 %v729_v51, %v2642_v14 }
 0x120   :  { %2116 = vmatprep.subr.mxu1 %v2591_v2  ;;  %1559 = vrot.lane.b32.xlu0 %v372_v52, %s2356_s26 }
 0x121   :  { %2117 = vmatpush3.msra.mxu1 %v2591_v2  ;;  %v725_v2 = vrot.slane %v710_v58, %v2678_v44  ;;  %v695_v36 = vrot.slane %v679_v1, %v2659_v27  ;;  %v681_v41 = vcombine.high %v679_v1, %v679_v1 }
 0x122   :  { %2118 = vmatprep.subr.mxu1 %v2598_v3 }
 0x123   :  { %2119 = vmatpush3.msra.mxu1 %v2598_v3  ;;  %v757_v3 = vmul.f32 %v721_v59, %v2622_v60  ;;  %v758_v42 = vmul.f32 %v725_v2, %v2632_v5  ;;  %v733_v61 = vrot.slane %v695_v36, %v2678_v44  ;;  %v709_v62 = vrot.slane %v681_v41, %v2659_v27 }
 0x124   :  { %2120 = vmatprep.subr.mxu1 %v2605_v18  ;;  %v761_v60 = vmul.f32 %v729_v51, %v2647_v17  ;;  %v711_v6 = vcombine.high %v695_v36, %v695_v36 }
 0x125   :  { %2121 = vmatpush3.msra.mxu1 %v2605_v18  ;;  %v759_v18 = vmul.f32 %v725_v2, %v2637_v7  ;;  %v762_v4 = vmul.f32 %v733_v61, %v2652_v24  ;;  %v737_v5 = vrot.slane %v709_v62, %v2678_v44  ;;  %v763_v7 = vmul.f32 %v733_v61, %v2662_v9 }
 0x126   :  { %2123 = vmatmul.mubr.msk.f32.vlgmr.msra.gmra.mxu1 %vm107_vm1, %v755_v29  ;;  %2177 = vmatprep.subr.mxu1 %v2354_v0  ;;  %v741_v11 = vrot.slane %v711_v6, %v2678_v44  ;;  %v713_v12 = vcombine.high %v709_v62, %v709_v62 }
 0x127   :  { %2125 = vmatprep.mubr.msk.f32.mxu1 %vm107_vm1, %v756_v35  ;;  %v764_v8 = vmul.f32 %v737_v5, %v2667_v10  ;;  %v765_v13 = vmul.f32 %v737_v5, %v2673_v39  ;;  %2178 = vmatpush3.msk.msra.mxu1 %vm1291_vm9, %v2756_v23 }
 0x128   :  { %v766_v14 = vmul.f32 %v741_v11, %v2681_v45  ;;  %v745_v15 = vrot.slane %v713_v12, %v2678_v44  ;;  %v767_v17 = vmul.f32 %v741_v11, %v2689_v47  ;;  %2182 = vmatprep.subr.mxu1 %v2354_v0 }
 0x12a   :  { %2126 = vmatmul.mubr.msk.f32.gmra.mxu1 %vm107_vm1, %v757_v3  ;;  %v768_v19 = vmul.f32 %v745_v15, %v584_v54  ;;  %v769_v20 = vmul.f32 %v745_v15, %v585_v56 }
 0x12b   :  { %2128 = vmatprep.mubr.msk.f32.mxu1 %vm107_vm1, %v758_v42 }
 0x12e   :  { %2129 = vmatmul.mubr.msk.f32.gmra.mxu1 %vm107_vm1, %v759_v18 }
 0x12f   :  { %2131 = vmatprep.mubr.msk.f32.mxu1 %vm107_vm1, %v760_v63 }
 0x132   :  { %2132 = vmatmul.mubr.msk.f32.gmra.mxu1 %vm107_vm1, %v761_v60 }
 0x133   :  { %2134 = vmatprep.mubr.msk.f32.mxu1 %vm107_vm1, %v762_v4 }
 0x136   :  { %2135 = vmatmul.mubr.msk.f32.gmra.mxu1 %vm107_vm1, %v763_v7 }
 0x137   :  { %2137 = vmatprep.mubr.msk.f32.mxu1 %vm107_vm1, %v764_v8 }
 0x13a   :  { %2138 = vmatmul.mubr.msk.f32.gmra.mxu1 %vm107_vm1, %v765_v13 }
 0x13b   :  { %2140 = vmatprep.mubr.msk.f32.mxu1 %vm107_vm1, %v766_v14 }
 0x13e   :  { %2141 = vmatmul.mubr.msk.f32.gmra.mxu1 %vm107_vm1, %v767_v17 }
 0x13f   :  { %2143 = vmatprep.mubr.msk.f32.mxu1 %vm107_vm1, %v768_v19 }
 0x142   :  { %2144 = vmatmul.mubr.msk.f32.gmra.mxu1 %vm107_vm1, %v769_v20 }
 0x143   :  { %2179 = vmatprep.mubr.msk.f32.mxu1 %vm2355_vm0, %v2354_v0 }
 0x1de   :  { %v2765_v24 = vpop.f32.mrf.mxu1 }
 0x1e0   :  { %v2113_v25 = vpop.f32.mrf.mxu1 }
 0x1e6   :  { %v2767_v26 = vpop.f32.mrf.mxu1 }
 0x1e7   :  { %v965_v46 = vsel %vm963_vm10, %v2767_v26, -inf }
 0x1e8   :  { %v2769_v9 = vpop.f32.mrf.mxu1 }
 0x1e9   :  { %v964_v37 = vsel %vm963_vm10, %v2769_v9, -inf }
 0x1ea   :  { %v2771_v30 = vpop.f32.mrf.mxu1  ;;  %v966_v47 = vmax.f32 %v964_v37, %v965_v46 }
 0x1eb   :  { %v974_v38 = vsel %vm963_vm10, %v2771_v30, -inf }
 0x1ec   :  { %v2773_v31 = vpop.f32.mrf.mxu1  ;;  %v967_v55 = vrot.slane %v966_v47, 4 }
 0x1ed   :  { %v973_v10 = vsel %vm963_vm10, %v2773_v31, -inf }
 0x1ee   :  { %v2775_v32 = vpop.f32.mrf.mxu1  ;;  %v975_v40 = vmax.f32 %v973_v10, %v974_v38  ;;  %v968_v34 = vmax.f32 %v966_v47, %v967_v55 }
 0x1ef   :  { %v983_v43 = vsel %vm963_vm10, %v2775_v32, -inf }
 0x1f0   :  { %v2779_v33 = vpop.f32.mrf.mxu1  ;;  %v976_v50 = vrot.slane %v975_v40, 4  ;;  %v969_v63 = vrot.slane %v968_v34, 2 }
 0x1f1   :  { %v982_v39 = vsel %vm963_vm10, %v2779_v33, -inf }
 0x1f2   :  { %v2789_v45 = vpop.f32.mrf.mxu1  ;;  %v984_v16 = vmax.f32 %v982_v39, %v983_v43  ;;  %v977_v58 = vmax.f32 %v975_v40, %v976_v50  ;;  %v970_v17 = vmax.f32 %v968_v34, %v969_v63 }
 0x1f3   :  { %v992_v21 = vsel %vm963_vm10, %v2789_v45, -inf }
 0x1f4   :  { %v2793_v48 = vpop.f32.mrf.mxu1  ;;  %v985_v54 = vrot.slane %v984_v16, 4  ;;  %v978_v42 = vrot.slane %v977_v58, 2 }
 0x1f5   :  { %v991_v49 = vsel %vm963_vm10, %v2793_v48, -inf }
 0x1f6   :  { %v993_v52 = vmax.f32 %v991_v49, %v992_v21  ;;  %v2799_v53 = vpop.f32.mrf.mxu1  ;;  %v986_v1 = vmax.f32 %v984_v16, %v985_v54  ;;  %v979_v11 = vmax.f32 %v977_v58, %v978_v42  ;;  %v971_v21 = vrot.slane %v970_v17, 1 }
 0x1f7   :  { %v1001_v57 = vsel %vm963_vm10, %v2799_v53, -inf }
 0x1f8   :  { %v994_v56 = vrot.slane %v993_v52, 4  ;;  %v2801_v22 = vpop.f32.mrf.mxu1  ;;  %v987_v62 = vrot.slane %v986_v1, 2  ;;  %v980_v40 = vrot.slane %v979_v11, 1 }
 0x1f9   :  { %v1000_v28 = vsel %vm963_vm10, %v2801_v22, -inf }
 0x1fa   :  { %v1002_v59 = vmax.f32 %v1000_v28, %v1001_v57  ;;  %v2807_v29 = vpop.f32.mrf.mxu1  ;;  %v995_v35 = vmax.f32 %v993_v52, %v994_v56  ;;  %v988_v15 = vmax.f32 %v986_v1, %v987_v62  ;;  %v981_v55 = vmax.f32 %v979_v11, %v980_v40 }
 0x1fb   :  { %v1010_v36 = vsel %vm963_vm10, %v2807_v29, -inf }
 0x1fc   :  { %v1003_v2 = vrot.slane %v1002_v59, 4  ;;  %v2809_v3 = vpop.f32.mrf.mxu1  ;;  %v996_v60 = vrot.slane %v995_v35, 2  ;;  %v989_v47 = vrot.slane %v988_v15, 1 }
 0x1fd   :  { %v1009_v41 = vsel %vm963_vm10, %v2809_v3, -inf }
 0x1fe   :  { %v1004_v51 = vmax.f32 %v1002_v59, %v1003_v2  ;;  %v1011_v18 = vmax.f32 %v1009_v41, %v1010_v36  ;;  %v2815_v61 = vpop.f32.mrf.mxu1  ;;  %v997_v19 = vmax.f32 %v995_v35, %v996_v60  ;;  %v990_v58 = vmax.f32 %v988_v15, %v989_v47 }
 0x1ff   :  { %v1019_v7 = vsel %vm963_vm10, %v2815_v61, -inf  ;;  %v972_v59 = vmax.f32 %v970_v17, %v971_v21 }
 0x200   :  { %v1012_v4 = vrot.slane %v1011_v18, 4  ;;  %v2817_v5 = vpop.f32.mrf.mxu1  ;;  %v1005_v6 = vrot.slane %v1004_v51, 2  ;;  %v998_v49 = vrot.slane %v997_v19, 1 }
 0x201   :  { %v1018_v8 = vsel %vm963_vm10, %v2817_v5, -inf  ;;  %v1044_v36 = vsel %vm208_vm2, %v981_v55, %v972_v59 }
 0x202   :  { %v1013_v12 = vmax.f32 %v1011_v18, %v1012_v4  ;;  %v1020_v13 = vmax.f32 %v1018_v8, %v1019_v7  ;;  %v2823_v14 = vpop.f32.mrf.mxu1  ;;  %v1006_v37 = vmax.f32 %v1004_v51, %v1005_v6  ;;  %v999_v1 = vmax.f32 %v997_v19, %v998_v49 }
 0x203   :  { %v1028_v38 = vsel %vm963_vm10, %v2823_v14, -inf  ;;  %v1045_v51 = vsel %vm210_vm3, %v990_v58, %v1044_v36 }
 0x204   :  { %v1014_v20 = vrot.slane %v1013_v12, 2  ;;  %v1021_v25 = vrot.slane %v1020_v13, 4  ;;  %v2825_v10 = vpop.f32.mrf.mxu1  ;;  %v1007_v54 = vrot.slane %v1006_v37, 1  ;;  %v1046_v62 = vsel %vm212_vm4, %v999_v1, %v1045_v51 }
 0x205   :  { %v1027_v39 = vsel %vm963_vm10, %v2825_v10, -inf }
 0x206   :  { %v1015_v43 = vmax.f32 %v1013_v12, %v1014_v20  ;;  %v1022_v46 = vmax.f32 %v1020_v13, %v1021_v25  ;;  %v1029_v16 = vmax.f32 %v1027_v39, %v1028_v38  ;;  %v1008_v2 = vmax.f32 %v1006_v37, %v1007_v54 }
 0x208   :  { %v1023_v50 = vrot.slane %v1022_v46, 2  ;;  %v1030_v52 = vrot.slane %v1029_v16, 4  ;;  %v1016_v56 = vrot.slane %v1015_v43, 1  ;;  %v1047_v60 = vsel %vm214_vm5, %v1008_v2, %v1046_v62 }
 0x20a   :  { %v1024_v57 = vmax.f32 %v1022_v46, %v1023_v50  ;;  %v1031_v28 = vmax.f32 %v1029_v16, %v1030_v52  ;;  %v1017_v41 = vmax.f32 %v1015_v43, %v1016_v56 }
 0x20c   :  { %v1025_v34 = vrot.slane %v1024_v57, 1  ;;  %v1032_v35 = vrot.slane %v1031_v28, 2  ;;  %v1048_v4 = vsel %vm216_vm6, %v1017_v41, %v1047_v60 }
 0x20e   :  { %v1033_v42 = vmax.f32 %v1031_v28, %v1032_v35  ;;  %v1026_v18 = vmax.f32 %v1024_v57, %v1025_v34 }
 0x210   :  { %v1034_v63 = vrot.slane %v1033_v42, 1  ;;  %v1049_v7 = vsel %vm218_vm7, %v1026_v18, %v1048_v4 }
 0x212   :  { %v1035_v6 = vmax.f32 %v1033_v42, %v1034_v63 }
 0x214   :  { %v1050_v8 = vsel %vm220_vm8, %v1035_v6, %v1049_v7 }
 0x215   :  { %v1052_v11 = vmax.f32 %v2765_v24, %v1050_v8 }
 0x217   :  { %v1053_v12 = vsub.f32 %v2765_v24, %v1052_v11  ;;  %v1057_v13 = vcombine.high %v1052_v11, %v1052_v11  ;;  %v1064_v15 = vrot.slane %v1052_v11, %v2659_v27 }
 0x219   :  { %v1054_v17 = vmul.f32 1.442695, %v1053_v12  ;;  %v1071_v19 = vrot.slane %v1057_v13, %v2659_v27  ;;  %v1072_v20 = vcombine.high %v1064_v15, %v1064_v15  ;;  %v1080_v25 = vrot.slane %v1064_v15, %v2659_v27 }
 0x21b   :  { %2204 = vpow2.f32 %v1054_v17  ;;  %v1073_v37 = vcombine.high %v1071_v19, %v1071_v19  ;;  %v1094_v38 = vrot.slane %v1072_v20, %v2659_v27  ;;  %v1102_v39 = vcombine.high %v1080_v25, %v1080_v25 }
 0x21c   :  { %v1109_v40 = vrot.slane %v1080_v25, %v2678_v44  ;;  %v1087_v43 = vrot.slane %v1071_v19, %v2659_v27 }
 0x21d   :  { %v1104_v46 = vcombine.high %v1094_v38, %v1094_v38  ;;  %v1113_v24 = vrot.slane %v1094_v38, %v2678_v44  ;;  %v1117_v16 = vrot.slane %v1102_v39, %v2678_v44  ;;  %v1101_v47 = vrot.slane %v1073_v37, %v2659_v27 }
 0x21e   :  { %v1146_v49 = vsub.f32 %v2769_v9, %v1109_v40  ;;  %v1147_v50 = vsub.f32 %v2767_v26, %v1109_v40  ;;  %v1103_v55 = vcombine.high %v1087_v43, %v1087_v43  ;;  %v1125_v56 = vrot.slane %v1087_v43, %v2678_v44 }
 0x21f   :  { %v1121_v21 = vrot.slane %v1104_v46, %v2678_v44  ;;  %v1148_v52 = vsub.f32 %v2773_v31, %v1113_v24  ;;  %v1149_v54 = vsub.f32 %v2771_v30, %v1113_v24  ;;  %v1150_v57 = vsub.f32 %v2779_v33, %v1117_v16 }
 0x220   :  { %v1151_v28 = vsub.f32 %v2775_v32, %v1117_v16  ;;  %v1105_v58 = vcombine.high %v1101_v47, %v1101_v47  ;;  %v1129_v27 = vrot.slane %v1101_v47, %v2678_v44  ;;  %v1162_v1 = vmul.f32 1.442695, %v1146_v49 }
 0x221   :  { %v1152_v59 = vsub.f32 %v2793_v48, %v1121_v21  ;;  %v1153_v9 = vsub.f32 %v2789_v45, %v1121_v21  ;;  %v1164_v26 = vmul.f32 1.442695, %v1147_v50  ;;  %v1166_v34 = vmul.f32 1.442695, %v1148_v52 }
 0x222   :  { %v1168_v31 = vmul.f32 1.442695, %v1149_v54  ;;  %v1133_v30 = vrot.slane %v1103_v55, %v2678_v44  ;;  %v1154_v35 = vsub.f32 %v2801_v22, %v1125_v56  ;;  %2206 = vpow2.f32 %v1162_v1 }
 0x223   :  { %v1170_v2 = vmul.f32 1.442695, %v1150_v57  ;;  %v1155_v33 = vsub.f32 %v2799_v53, %v1125_v56  ;;  %2208 = vpow2.f32 %v1164_v26  ;;  %v1172_v32 = vmul.f32 1.442695, %v1151_v28 }
 0x224   :  { %v1137_v36 = vrot.slane %v1105_v58, %v2678_v44  ;;  %v1156_v48 = vsub.f32 %v2809_v3, %v1129_v27  ;;  %2210 = vpow2.f32 %v1166_v34  ;;  %v1174_v41 = vmul.f32 1.442695, %v1152_v59 }
 0x225   :  { %v1157_v42 = vsub.f32 %v2807_v29, %v1129_v27  ;;  %2212 = vpow2.f32 %v1168_v31  ;;  %v1176_v51 = vmul.f32 1.442695, %v1153_v9  ;;  %v1158_v22 = vsub.f32 %v2817_v5, %v1133_v30 }
 0x226   :  { %2214 = vpow2.f32 %v1170_v2  ;;  %v1178_v18 = vmul.f32 1.442695, %v1154_v35  ;;  %v1159_v53 = vsub.f32 %v2815_v61, %v1133_v30  ;;  %v1180_v44 = vmul.f32 1.442695, %v1155_v33 }
 0x227   :  { %2216 = vpow2.f32 %v1172_v32  ;;  %v1160_v3 = vsub.f32 %v2825_v10, %v1137_v36  ;;  %v1182_v29 = vmul.f32 1.442695, %v1156_v48  ;;  %v1161_v62 = vsub.f32 %v2823_v14, %v1137_v36 }
 0x228   :  { %v2865_v45 = vpop.eup %2204  ;;  %2218 = vpow2.f32 %v1174_v41  ;;  %v1184_v5 = vmul.f32 1.442695, %v1157_v42  ;;  %v1186_v63 = vmul.f32 1.442695, %v1158_v22  ;;  %v1188_v60 = vmul.f32 1.442695, %v1159_v53 }
 0x229   :  { %2149 = vmatmul.mubr.msk.f32.vlgmr.msra.gmra.mxu0 %vm963_vm10, %v2865_v45  ;;  %2220 = vpow2.f32 %v1176_v51  ;;  %v1190_v4 = vmul.f32 1.442695, %v1160_v3  ;;  %v1192_v61 = vmul.f32 1.442695, %v1161_v62 }
 0x22a   :  { %2152 = vmatpush3.msk.msra.mxu0 %vm1291_vm9, %v2756_v23  ;;  %2222 = vpow2.f32 %v1178_v18 }
 0x22b   :  { %2224 = vpow2.f32 %v1180_v44 }
 0x22c   :  { %2226 = vpow2.f32 %v1182_v29 }
 0x22d   :  { %2228 = vpow2.f32 %v1184_v5 }
 0x22e   :  { %2230 = vpow2.f32 %v1186_v63 }
 0x22f   :  { %v2207_v6 = vpop.eup %2206  ;;  %2232 = vpow2.f32 %v1188_v60 }
 0x230   :  { %v2209_v23 = vpop.eup %2208  ;;  %2234 = vpow2.f32 %v1190_v4  ;;  %v1194_v10 = vsel %vm963_vm10, %v2207_v6, 0.0  ;;  %2153 = vmatprep.mubr.msk.f32.mxu0 %vm963_vm10, %v2207_v6 }
 0x231   :  { %v2211_v14 = vpop.eup %2210  ;;  %2236 = vpow2.f32 %v1192_v61  ;;  %v1195_v7 = vsel %vm963_vm10, %v2209_v23, 0.0  ;;  %2154 = vmatmul.mubr.msk.f32.vlgmr.msra.gmra.mxu0 %vm963_vm10, %v2209_v23 }
 0x232   :  { %v2213_v8 = vpop.eup %2212  ;;  %v1196_v11 = vadd.f32 %v1195_v7, %v1194_v10  ;;  %v1203_v12 = vsel %vm963_vm10, %v2211_v14, 0.0  ;;  %2156 = vmatprep.mubr.msk.f32.mxu0 %vm963_vm10, %v2211_v14 }
 0x233   :  { %v2215_v13 = vpop.eup %2214  ;;  %v1204_v15 = vsel %vm963_vm10, %v2213_v8, 0.0 }
 0x234   :  { %v2217_v17 = vpop.eup %2216  ;;  %v1197_v19 = vrot.slane %v1196_v11, 4  ;;  %v1205_v20 = vadd.f32 %v1204_v15, %v1203_v12  ;;  %v1212_v25 = vsel %vm963_vm10, %v2215_v13, 0.0 }
 0x235   :  { %v2219_v37 = vpop.eup %2218  ;;  %v1213_v38 = vsel %vm963_vm10, %v2217_v17, 0.0  ;;  %2157 = vmatmul.mubr.msk.f32.gmra.mxu0 %vm963_vm10, %v2213_v8 }
 0x236   :  { %v2221_v39 = vpop.eup %2220  ;;  %v1198_v40 = vadd.f32 %v1197_v19, %v1196_v11  ;;  %v1206_v43 = vrot.slane %v1205_v20, 4  ;;  %v1214_v46 = vadd.f32 %v1213_v38, %v1212_v25  ;;  %2159 = vmatprep.mubr.msk.f32.mxu0 %vm963_vm10, %v2215_v13  ;;  %v1221_v24 = vsel %vm963_vm10, %v2219_v37, 0.0 }
 0x237   :  { %v2223_v16 = vpop.eup %2222  ;;  %v1222_v47 = vsel %vm963_vm10, %v2221_v39, 0.0 }
 0x238   :  { %v2225_v21 = vpop.eup %2224  ;;  %v1199_v49 = vrot.slane %v1198_v40, 2  ;;  %v1207_v50 = vadd.f32 %v1206_v43, %v1205_v20  ;;  %v1230_v52 = vsel %vm963_vm10, %v2223_v16, 0.0  ;;  %v1215_v54 = vrot.slane %v1214_v46, 4 }
 0x239   :  { %v2227_v55 = vpop.eup %2226  ;;  %v1231_v56 = vsel %vm963_vm10, %v2225_v21, 0.0  ;;  %2160 = vmatmul.mubr.msk.f32.gmra.mxu0 %vm963_vm10, %v2217_v17  ;;  %v1223_v57 = vadd.f32 %v1222_v47, %v1221_v24 }
 0x23a   :  { %v2229_v28 = vpop.eup %2228  ;;  %v1232_v58 = vadd.f32 %v1231_v56, %v1230_v52  ;;  %v1239_v27 = vsel %vm963_vm10, %v2227_v55, 0.0  ;;  %2162 = vmatprep.mubr.msk.f32.mxu0 %vm963_vm10, %v2219_v37  ;;  %v1200_v59 = vadd.f32 %v1199_v49, %v1198_v40  ;;  %v1208_v1 = vrot.slane %v1207_v50, 2 }
 0x23b   :  { %v2231_v9 = vpop.eup %2230  ;;  %v1240_v26 = vsel %vm963_vm10, %v2229_v28, 0.0  ;;  %v1216_v34 = vadd.f32 %v1215_v54, %v1214_v46  ;;  %v1224_v31 = vrot.slane %v1223_v57, 4 }
 0x23c   :  { %v2233_v30 = vpop.eup %2232  ;;  %v1233_v35 = vrot.slane %v1232_v58, 4  ;;  %v1241_v2 = vadd.f32 %v1240_v26, %v1239_v27  ;;  %v1248_v33 = vsel %vm963_vm10, %v2231_v9, 0.0  ;;  %v1201_v32 = vrot.slane %v1200_v59, 1 }
 0x23d   :  { %v2235_v36 = vpop.eup %2234  ;;  %v1249_v48 = vsel %vm963_vm10, %v2233_v30, 0.0  ;;  %2163 = vmatmul.mubr.msk.f32.gmra.mxu0 %vm963_vm10, %v2221_v39  ;;  %v1209_v41 = vadd.f32 %v1208_v1, %v1207_v50  ;;  %v1217_v42 = vrot.slane %v1216_v34, 2  ;;  %v1225_v51 = vadd.f32 %v1224_v31, %v1223_v57  ;;  %v1808_v31 = vld [vmem:[#allocation8 + $0x10] sm:$0xff] }
 0x23e   :  { %v2237_v22 = vpop.eup %2236  ;;  %v1234_v18 = vadd.f32 %v1233_v35, %v1232_v58  ;;  %v1242_v53 = vrot.slane %v1241_v2, 4  ;;  %v1257_v44 = vsel %vm963_vm10, %v2235_v36, 0.0  ;;  %2165 = vmatprep.mubr.msk.f32.mxu0 %vm963_vm10, %v2223_v16  ;;  %v1250_v61 = vadd.f32 %v1249_v48, %v1248_v33  ;;  %v1586_v35 = vpop.permute.xlu1 %1585 }
 0x23f   :  { %v1258_v3 = vsel %vm963_vm10, %v2237_v22, 0.0  ;;  %v1210_v29 = vrot.slane %v1209_v41, 1  ;;  %v1218_v62 = vadd.f32 %v1217_v42, %v1216_v34  ;;  %v1226_v5 = vrot.slane %v1225_v51, 2  ;;  %v1809_v34 = vld [vmem:[#allocation8 + $0x18] sm:$0xff] }
 0x240   :  { %v1235_v63 = vrot.slane %v1234_v18, 2  ;;  %v1243_v60 = vadd.f32 %v1242_v53, %v1241_v2  ;;  %v1259_v4 = vadd.f32 %v1258_v3, %v1257_v44  ;;  %v1202_v6 = vadd.f32 %v1201_v32, %v1200_v59  ;;  %v1582_v2 = vpop.permute.xlu0 %1581 }
 0x241   :  { %2166 = vmatmul.mubr.msk.f32.gmra.mxu0 %vm963_vm10, %v2225_v21  ;;  %v1211_v23 = vadd.f32 %v1210_v29, %v1209_v41  ;;  %v1219_v10 = vrot.slane %v1218_v62, 1  ;;  %v1227_v14 = vadd.f32 %v1226_v5, %v1225_v51  ;;  %v1251_v12 = vrot.slane %v1250_v61, 4 }
 0x242   :  { %v1244_v7 = vrot.slane %v1243_v60, 2  ;;  %v1260_v8 = vrot.slane %v1259_v4, 4  ;;  %2168 = vmatprep.mubr.msk.f32.mxu0 %vm963_vm10, %v2227_v55  ;;  %v1236_v11 = vadd.f32 %v1235_v63, %v1234_v18 }
 0x243   :  { %v1220_v13 = vadd.f32 %v1219_v10, %v1218_v62  ;;  %v1228_v15 = vrot.slane %v1227_v14, 1  ;;  %v1274_v17 = vsel %vm208_vm2, %v1211_v23, %v1202_v6  ;;  %v1252_v37 = vadd.f32 %v1251_v12, %v1250_v61 }
 0x244   :  { %v1245_v19 = vadd.f32 %v1244_v7, %v1243_v60  ;;  %v1261_v20 = vadd.f32 %v1260_v8, %v1259_v4  ;;  %v1237_v25 = vrot.slane %v1236_v11, 1  ;;  %v1580_v48 = vpop.permute.xlu0 %1579 }
 0x245   :  { %2169 = vmatmul.mubr.msk.f32.gmra.mxu0 %vm963_vm10, %v2229_v28  ;;  %v1229_v38 = vadd.f32 %v1228_v15, %v1227_v14  ;;  %v1275_v39 = vsel %vm210_vm3, %v1220_v13, %v1274_v17  ;;  %v1253_v24 = vrot.slane %v1252_v37, 2 }
 0x246   :  { %v1246_v40 = vrot.slane %v1245_v19, 1  ;;  %v1262_v43 = vrot.slane %v1261_v20, 2  ;;  %2171 = vmatprep.mubr.msk.f32.mxu0 %vm963_vm10, %v2231_v9  ;;  %v1238_v46 = vadd.f32 %v1237_v25, %v1236_v11 }
 0x247   :  { %v1276_v16 = vsel %vm212_vm4, %v1229_v38, %v1275_v39  ;;  %v1254_v21 = vadd.f32 %v1253_v24, %v1252_v37 }
 0x248   :  { %v1263_v47 = vadd.f32 %v1262_v43, %v1261_v20  ;;  %v1277_v49 = vsel %vm214_vm5, %v1238_v46, %v1276_v16  ;;  %v1247_v50 = vadd.f32 %v1246_v40, %v1245_v19  ;;  %v1588_v42 = vpop.permute.xlu0 %1587 }
 0x249   :  { %2172 = vmatmul.mubr.msk.f32.gmra.mxu0 %vm963_vm10, %v2233_v30  ;;  %v1255_v54 = vrot.slane %v1254_v21, 1  ;;  %v1807_v30 = vld [vmem:[#allocation8 + $0x8] sm:$0xff] }
 0x24a   :  { %v1264_v52 = vrot.slane %v1263_v47, 1  ;;  %2174 = vmatprep.mubr.msk.f32.mxu0 %vm963_vm10, %v2235_v36  ;;  %v1278_v55 = vsel %vm216_vm6, %v1247_v50, %v1277_v49  ;;  %v1584_v36 = vpop.permute.xlu1 %1583 }
 0x24b   :  { %v1256_v56 = vadd.f32 %v1255_v54, %v1254_v21 }
 0x24c   :  { %v1265_v57 = vadd.f32 %v1264_v52, %v1263_v47  ;;  %v1592_v44 = vpop.permute.xlu0 %1591 }
 0x24d   :  { %2175 = vmatmul.mubr.msk.f32.gmra.mxu0 %vm963_vm10, %v2237_v22  ;;  %v1279_v28 = vsel %vm218_vm7, %v1256_v56, %v1278_v55 }
 0x24e   :  { %v1280_v58 = vsel %vm220_vm8, %v1265_v57, %v1279_v28  ;;  %v1590_v41 = vpop.permute.xlu1 %1589 }
 0x24f   :  { %v1282_v27 = vadd.f32 %v2865_v45, %v1280_v58  ;;  %v1806_v45 = vld [vmem:[#allocation8] sm:$0xff] }
 0x250   :  { %v1596_v10 = vpop.permute.xlu0 %1595 }
 0x251   :  { %2238 = vrcp.f32 %v1282_v27 }
 0x252   :  { %v1594_v18 = vpop.permute.xlu1 %1593 }
 0x254   :  { %v1600_v24 = vpop.permute.xlu0 %1599 }
 0x256   :  { %v1598_v63 = vpop.permute.xlu1 %1597 }
 0x25a   :  { %v1602_v37 = vpop.permute.xlu1 %1601 }
 0x25e   :  { %v2239_v59 = vpop.eup %2238  ;;  %v1606_v58 = vpop.permute.xlu1 %1605 }
 0x25f   :  { %v1284_v1 = vmul.f32 %v2239_v59, %v1282_v27 }
 0x261   :  { %v1285_v9 = vsub.f32 2.0, %v1284_v1 }
 0x263   :  { %v1286_v26 = vmul.f32 %v2239_v59, %v1285_v9 }
 0x265   :  { %2180 = vmatmul.mubr.msk.f32.vlgmr.msra.gmra.mxu1 %vm963_vm10, %v1286_v26 }
 0x266   :  { %2190 = vmatprep.mubr.msk.f32.mxu1 %vm2355_vm0, %v2354_v0  ;;  %2183 = vmatpush3.msra.mxu1 %v1809_v34  ;;  %v1604_v34 = vpop.permute.xlu0 %1603 }
 0x267   :  { %2184 = vmatprep.subr.mxu1 %v2354_v0 }
 0x268   :  { %2185 = vmatpush3.msra.mxu1 %v1808_v31 }
 0x269   :  { %2186 = vmatprep.subr.mxu1 %v2354_v0 }
 0x26a   :  { %2187 = vmatpush3.msra.mxu1 %v1807_v30 }
 0x26b   :  { %2188 = vmatprep.subr.mxu1 %v2354_v0 }
 0x26c   :  { %2189 = vmatpush3.msra.mxu1 %v1806_v45 }
 0x2e9   :  { %v2922_v33 = vpop.f32.mrf.mxu0 }
 0x2eb   :  { %v2150_v32 = vpop.f32.mrf.mxu0 }
 0x2f1   :  { %v2155_v51 = vpop.f32.mrf.mxu0 }
 0x2f2   :  { %v1628_v61 = vmul.f32 %v2155_v51, %v1582_v2 }
 0x2f3   :  { %v1479_v22 = vpop.f32.mrf.mxu0 }
 0x2f4   :  { %v1627_v5 = vmul.f32 %v1580_v48, %v1479_v22  ;;  %v1644_v19 = vsel %vm107_vm1, %v1628_v61, 0.0 }
 0x2f5   :  { %v2158_v53 = vpop.f32.mrf.mxu0 }
 0x2f6   :  { %v1630_v0 = vmul.f32 %v2158_v53, %v1586_v35  ;;  %v1643_v7 = vsel %vm107_vm1, %v1627_v5, 0.0  ;;  %v1610_v53 = vpop.permute.xlu1 %1609 }
 0x2f7   :  { %v1489_v3 = vpop.f32.mrf.mxu0  ;;  %v1645_v38 = vadd.f32 %v1644_v19, %v1643_v7 }
 0x2f8   :  { %v1629_v29 = vmul.f32 %v1584_v36, %v1489_v3  ;;  %v1653_v8 = vsel %vm107_vm1, %v1630_v0, 0.0 }
 0x2f9   :  { %v2161_v62 = vpop.f32.mrf.mxu0  ;;  %v1646_v52 = vrot.slane %v1645_v38, 4 }
 0x2fa   :  { %v1632_v60 = vmul.f32 %v2161_v62, %v1590_v41  ;;  %v1652_v6 = vsel %vm107_vm1, %v1629_v29, 0.0 }
 0x2fb   :  { %v1499_v4 = vpop.f32.mrf.mxu0  ;;  %v1654_v13 = vadd.f32 %v1653_v8, %v1652_v6  ;;  %v1647_v31 = vadd.f32 %v1646_v52, %v1645_v38 }
 0x2fc   :  { %v1631_v23 = vmul.f32 %v1588_v42, %v1499_v4  ;;  %v1662_v15 = vsel %vm107_vm1, %v1632_v60, 0.0  ;;  %v1608_v4 = vpop.permute.xlu0 %1607 }
 0x2fd   :  { %v2164_v14 = vpop.f32.mrf.mxu0  ;;  %v1655_v16 = vrot.slane %v1654_v13, 4 }
 0x2fe   :  { %v1661_v11 = vsel %vm107_vm1, %v1631_v23, 0.0  ;;  %v1634_v12 = vmul.f32 %v2164_v14, %v1594_v18 }
 0x2ff   :  { %v1509_v17 = vpop.f32.mrf.mxu0  ;;  %v1663_v20 = vadd.f32 %v1662_v15, %v1661_v11  ;;  %v1656_v27 = vadd.f32 %v1655_v16, %v1654_v13 }
 0x300   :  { %v1633_v25 = vmul.f32 %v1592_v44, %v1509_v17  ;;  %v1671_v40 = vsel %vm107_vm1, %v1634_v12, 0.0  ;;  %v1648_v44 = vrot.slane %v1647_v31, 2 }
 0x301   :  { %v2167_v39 = vpop.f32.mrf.mxu0  ;;  %v1664_v49 = vrot.slane %v1663_v20, 4  ;;  %v1657_v48 = vrot.slane %v1656_v27, 2 }
 0x302   :  { %v1670_v43 = vsel %vm107_vm1, %v1633_v25, 0.0  ;;  %v1636_v46 = vmul.f32 %v2167_v39, %v1598_v63  ;;  %v1649_v8 = vadd.f32 %v1648_v44, %v1647_v31 }
 0x303   :  { %v1672_v47 = vadd.f32 %v1671_v40, %v1670_v43  ;;  %v1519_v21 = vpop.f32.mrf.mxu0  ;;  %v1665_v9 = vadd.f32 %v1664_v49, %v1663_v20  ;;  %v1658_v61 = vadd.f32 %v1657_v48, %v1656_v27 }
 0x304   :  { %v1635_v50 = vmul.f32 %v1596_v10, %v1519_v21  ;;  %v1680_v56 = vsel %vm107_vm1, %v1636_v46, 0.0  ;;  %v1650_v40 = vrot.slane %v1649_v8, 1 }
 0x305   :  { %v1673_v54 = vrot.slane %v1672_v47, 4  ;;  %v2170_v55 = vpop.f32.mrf.mxu0  ;;  %v1666_v22 = vrot.slane %v1665_v9, 2  ;;  %v1659_v20 = vrot.slane %v1658_v61, 1 }
 0x306   :  { %v1679_v57 = vsel %vm107_vm1, %v1635_v50, 0.0  ;;  %v1638_v28 = vmul.f32 %v2170_v55, %v1602_v37 }
 0x307   :  { %v1681_v59 = vadd.f32 %v1680_v56, %v1679_v57  ;;  %v1529_v1 = vpop.f32.mrf.mxu0  ;;  %v1674_v30 = vadd.f32 %v1673_v54, %v1672_v47  ;;  %v1667_v14 = vadd.f32 %v1666_v22, %v1665_v9  ;;  %v1660_v47 = vadd.f32 %v1659_v20, %v1658_v61  ;;  %v1966_v22 = vld [vmem:[%s2962_s7] ss:$0 sm:$0xff] }
 0x308   :  { %v1637_v26 = vmul.f32 %v1600_v24, %v1529_v1  ;;  %v1689_v2 = vsel %vm107_vm1, %v1638_v28, 0.0  ;;  %v1651_v54 = vadd.f32 %v1650_v40, %v1649_v8 }
 0x309   :  { %v1682_v45 = vrot.slane %v1681_v59, 4  ;;  %v2173_v35 = vpop.f32.mrf.mxu0  ;;  %v1675_v3 = vrot.slane %v1674_v30, 2  ;;  %v1668_v39 = vrot.slane %v1667_v14, 1 }
 0x30a   :  { %v1688_v32 = vsel %vm107_vm1, %v1637_v26, 0.0  ;;  %v1640_v36 = vmul.f32 %v2173_v35, %v1606_v58  ;;  %v1723_v58 = vsel %vm208_vm2, %v1660_v47, %v1651_v54  ;;  %v1560_v35 = vpop.permute.xlu0 %1559 }
 0x30b   :  { %v1683_v41 = vadd.f32 %v1682_v45, %v1681_v59  ;;  %v1690_v42 = vadd.f32 %v1689_v2, %v1688_v32  ;;  %v1539_v51 = vpop.f32.mrf.mxu0  ;;  %v1676_v11 = vadd.f32 %v1675_v3, %v1674_v30  ;;  %v1669_v52 = vadd.f32 %v1668_v39, %v1667_v14 }
 0x30c   :  { %v1639_v18 = vmul.f32 %v1604_v34, %v1539_v51  ;;  %v1698_v0 = vsel %vm107_vm1, %v1640_v36, 0.0  ;;  %v1562_v32 = vmul.f32 %v1560_v35, %v2922_v33 }
 0x30d   :  { %v1691_v29 = vrot.slane %v1690_v42, 4  ;;  %v2176_v62 = vpop.f32.mrf.mxu0  ;;  %v1684_v5 = vrot.slane %v1683_v41, 2  ;;  %v1677_v43 = vrot.slane %v1676_v11, 1  ;;  %v1724_v1 = vsel %vm210_vm3, %v1669_v52, %v1723_v58 }
 0x30e   :  { %v1697_v63 = vsel %vm107_vm1, %v1639_v18, 0.0  ;;  %v1642_v60 = vmul.f32 %v2176_v62, %v1610_v53 }
 0x30f   :  { %v1692_v6 = vadd.f32 %v1691_v29, %v1690_v42  ;;  %v1699_v23 = vadd.f32 %v1698_v0, %v1697_v63  ;;  %v1549_v10 = vpop.f32.mrf.mxu0  ;;  %v1685_v15 = vadd.f32 %v1684_v5, %v1683_v41  ;;  %v1678_v55 = vadd.f32 %v1677_v43, %v1676_v11 }
 0x310   :  { %v1641_v7 = vmul.f32 %v1608_v4, %v1549_v10  ;;  %v1707_v17 = vsel %vm107_vm1, %v1642_v60, 0.0 }
 0x311   :  { %v1693_v12 = vrot.slane %v1692_v6, 2  ;;  %v1700_v13 = vrot.slane %v1699_v23, 4  ;;  %v1686_v16 = vrot.slane %v1685_v15, 1  ;;  %v1725_v34 = vsel %vm212_vm4, %v1678_v55, %v1724_v1 }
 0x312   :  { %v1706_v19 = vsel %vm107_vm1, %v1641_v7, 0.0 }
 0x313   :  { %v1694_v25 = vadd.f32 %v1693_v12, %v1692_v6  ;;  %v1701_v37 = vadd.f32 %v1700_v13, %v1699_v23  ;;  %v1708_v38 = vadd.f32 %v1707_v17, %v1706_v19  ;;  %v1687_v28 = vadd.f32 %v1686_v16, %v1685_v15 }
 0x315   :  { %v1702_v46 = vrot.slane %v1701_v37, 2  ;;  %v1709_v24 = vrot.slane %v1708_v38, 4  ;;  %v1695_v21 = vrot.slane %v1694_v25, 1  ;;  %v1726_v31 = vsel %vm214_vm5, %v1687_v28, %v1725_v34 }
 0x317   :  { %v1703_v49 = vadd.f32 %v1702_v46, %v1701_v37  ;;  %v1710_v50 = vadd.f32 %v1709_v24, %v1708_v38  ;;  %v1696_v27 = vadd.f32 %v1695_v21, %v1694_v25 }
 0x319   :  { %v1704_v56 = vrot.slane %v1703_v49, 1  ;;  %v1711_v57 = vrot.slane %v1710_v50, 2  ;;  %v1727_v45 = vsel %vm216_vm6, %v1696_v27, %v1726_v31 }
 0x31b   :  { %v1712_v59 = vadd.f32 %v1711_v57, %v1710_v50  ;;  %v1705_v9 = vadd.f32 %v1704_v56, %v1703_v49 }
 0x31d   :  { %v1713_v26 = vrot.slane %v1712_v59, 1  ;;  %v1728_v2 = vsel %vm218_vm7, %v1705_v9, %v1727_v45 }
 0x31f   :  { %v1714_v30 = vadd.f32 %v1713_v26, %v1712_v59 }
 0x321   :  { %v1729_v36 = vsel %vm220_vm8, %v1714_v30, %v1728_v2 }
 0x322   :  { %v1731_v48 = vadd.f32 %v1729_v36, %v1562_v32 }
 0x325   :  { %v1801_v41 = vpop.f32.mrf.mxu1 }
 0x326   :  { %v1805_v42 = vmul.f32 %v1801_v41, %v1731_v48 }
 0x327   :  { %v2181_v51 = vpop.f32.mrf.mxu1 }
 0x328   :  { %2191 = vmatmul.mubr.msk.f32.vlgmr.msra.gmra.mxu1 %vm107_vm1, %v1805_v42 }
 0x3e8   :  { %v1886_v18 = vpop.f32.mrf.mxu1 }
 0x3e9   :  { %v1887_v53 = vadd.f32 %v1966_v22, %v1886_v18 }
 0x3ea   :  { %v2192_v44 = vpop.f32.mrf.mxu1 }
 0x3eb   :  { %1890 = vst [vmem:[#allocation10] sm:$0xff] %v1887_v53 }
 0x3ec   :  { %2331 = shalt.err (!%p2328_p10)
}
 0x3ed   :  { %1900 = dma.vmem_to_hbm [thread:$0]  %s1898_s0, 128, %s2965_s10, [#allocation4]  }
 0x3ee   :  { %2346 = dma.done.wait [#allocation4], 128  }
 0x3ef   :  { %2347 = vsyncadd [#allocation4], 4294967168 }
 0x3f0   :  { %1904 = vsyncpa [#allocation3], 1 }
 0x3f1   :  { %1905 = vsyncpa [#allocation6], 1 }
 0x3f2   :  { %1906 = vsyncpa [#allocation9], 1 }
 0x3f3   :  { %1907 = vsyncpa [#allocation4], 1 }

</bundles_post_ra>
